<compile_context>
chip_gen: v5e
topology: v5e:2x2
jax: 0.10.0
libtpu: 0.0.40
codegen_flags: <defaults>
</compile_context>

<pallas_src>
import functools

import jax
import jax.numpy as jnp
from jax.experimental import pallas as pl
from jax.experimental.pallas import tpu as pltpu

# Hyperparameters implied by the module.
BASE_N_COUNT = 32
DATA_DIM = 64

# Fold factor chosen so every folded feature width is a multiple of 128 lanes.
FOLD = 128 // BASE_N_COUNT          # = 4
BATCH = 512                         # example batch (any size works; wrapper pads)
BATCH_TILE = 256                    # 256 samples / grid step -> grid = (2,)


def gen_mlp_kernel(x_ref, w1_ref, b1_ref, w2_ref, b2_ref, w3_ref, b3_ref, o_ref):
    """Fused folded MLP: (Linear+ReLU) -> (Linear+ReLU) -> (Linear+Sigmoid).

    All matmul operands are bf16 (f32 accumulation on the MXU); biases stay f32.
    Shapes per grid step (rows = BATCH_TILE // FOLD = 64):
      x:  (64, 128)  w1: (128, 256)  w2: (256, 512)  w3: (512, 256)  out: (64, 256)
    """
    x = x_ref[...]                                                    # bf16
    h1 = jnp.dot(x, w1_ref[...], preferred_element_type=jnp.float32) + b1_ref[...]
    h1 = jnp.maximum(h1, 0.0).astype(jnp.bfloat16)
    h2 = jnp.dot(h1, w2_ref[...], preferred_element_type=jnp.float32) + b2_ref[...]
    h2 = jnp.maximum(h2, 0.0).astype(jnp.bfloat16)
    z = jnp.dot(h2, w3_ref[...], preferred_element_type=jnp.float32) + b3_ref[...]
    o_ref[...] = jax.nn.sigmoid(z).astype(o_ref.dtype)                # lane-dense bf16 store


@functools.partial(jax.jit, static_argnames=("batch_tile",))
def gen_forward(x, folded_params, batch_tile=BATCH_TILE):
    """x: (B, base_n_count) f32/bf16 -> (B, data_dim) bf16."""
    # TODO(synk): for very small batches (< ~64) a plain XLA x @ W chain would
    # beat the Pallas path (kernel launch overhead dominates there).
    w1, b1, w2, b2, w3, b3 = folded_params
    B, d_in = x.shape
    fold = w1.shape[0] // d_in                 # = FOLD
    d_out_f = w3.shape[1]                      # fold * data_dim
    d_out = d_out_f // fold

    assert batch_tile % (8 * fold) == 0        # sublane alignment of folded rows

    # Pad ragged batches to a multiple of the batch tile (sliced off at the end).
    B_pad = ((B + batch_tile - 1) // batch_tile) * batch_tile
    xb = x.astype(jnp.bfloat16)
    if B_pad != B:
        xb = jnp.pad(xb, ((0, B_pad - B), (0, 0)))

    rows_per_block = batch_tile // fold
    # Free row-major reshape: `fold` consecutive samples share one 128-lane row.
    xb = xb.reshape(B_pad // fold, fold * d_in)

    grid = (B_pad // batch_tile,)

    # Weights/biases: full block, constant index_map -> fetched once, resident.
    def full(a):
        return pl.BlockSpec(a.shape, lambda i: (0,) * a.ndim)

    out_folded = pl.pallas_call(
        gen_mlp_kernel,
        out_shape=jax.ShapeDtypeStruct((B_pad // fold, d_out_f), jnp.bfloat16),
        grid_spec=pltpu.PrefetchScalarGridSpec(
            num_scalar_prefetch=0,
            grid=grid,
            in_specs=[
                pl.BlockSpec((rows_per_block, fold * d_in), lambda i: (i, 0)),  # x
                full(w1), full(b1),
                full(w2), full(b2),
                full(w3), full(b3),
            ],
            out_specs=pl.BlockSpec((rows_per_block, d_out_f), lambda i: (i, 0)),
        ),
        compiler_params=pltpu.CompilerParams(
            dimension_semantics=("parallel",),   # shard batch steps across TCs (v7x)
        ),
    )(xb, w1, b1, w2, b2, w3, b3)

    # Free row-major reshape back to (B_pad, data_dim), drop padding rows.
    out = out_folded.reshape(B_pad, d_out)
    return out[:B] if B_pad != B else out


# ----------------------------------------------------------------------------
# Parameter construction / folding
# ----------------------------------------------------------------------------
def xavier_uniform(key, fan_in, fan_out, dtype=jnp.float32):
    limit = jnp.sqrt(6.0 / (fan_in + fan_out)).astype(dtype)
    return jax.random.uniform(key, (fan_in, fan_out), dtype, -limit, limit)


def init_params(key):
    """Unfolded f32 params: W_i stored (in, out), b_i stored (1, out)."""
    dims = [BASE_N_COUNT, BASE_N_COUNT * 2, BASE_N_COUNT * 4, DATA_DIM]
    keys = jax.random.split(key, 6)
    params = []
    for i, (din, dout) in enumerate(zip(dims[:-1], dims[1:])):
        w = xavier_uniform(keys[2 * i], din, dout)
        bound = 1.0 / jnp.sqrt(float(din))
        b = jax.random.uniform(keys[2 * i + 1], (1, dout), jnp.float32, -bound, bound)
        params.extend([w, b])
    return tuple(params)


def _block_diag(w, fold):
    din, dout = w.shape
    out = jnp.zeros((fold * din, fold * dout), w.dtype)
    for f in range(fold):
        out = out.at[f * din:(f + 1) * din, f * dout:(f + 1) * dout].set(w)
    return out


def fold_params(params, fold=FOLD):
    """One-time host-side prep: block-diagonal bf16 weights, tiled f32 biases."""
    w1, b1, w2, b2, w3, b3 = params
    bd = lambda w: _block_diag(w, fold).astype(jnp.bfloat16)
    tb = lambda b: jnp.tile(b, (1, fold)).astype(jnp.float32)
    return (bd(w1), tb(b1), bd(w2), tb(b2), bd(w3), tb(b3))


# ----------------------------------------------------------------------------
# Reference (mirrors the kernel's bf16-input / f32-accumulate arithmetic)
# ----------------------------------------------------------------------------
def reference_forward(x, params):
    w1, b1, w2, b2, w3, b3 = params
    rb = lambda a: a.astype(jnp.bfloat16).astype(jnp.float32)
    h1 = jnp.maximum(rb(x) @ rb(w1) + b1, 0.0)
    h2 = jnp.maximum(rb(h1) @ rb(w2) + b2, 0.0)
    return jax.nn.sigmoid(rb(h2) @ rb(w3) + b3)


if __name__ == "__main__":
    key = jax.random.PRNGKey(0)
    k_x, k_p = jax.random.split(key)
    x = jax.random.normal(k_x, (BATCH, BASE_N_COUNT), jnp.float32)
    params = init_params(k_p)
    folded = fold_params(params, FOLD)

    out = gen_forward(x, folded, batch_tile=BATCH_TILE)
    out = jax.block_until_ready(out)

    ref = reference_forward(x, params)
    assert out.shape == (BATCH, DATA_DIM)
    # bf16 IO / bf16 MXU with f32 accumulation -> loosened tolerance.
    assert jnp.allclose(out.astype(jnp.float32), ref, atol=1e-2, rtol=1e-2)
    print("KERNEL_OK")
</pallas_src>

<mosaic_0001>
module attributes {stable_mosaic.version = 11 : i64} {
  func.func @gen_mlp_kernel(%arg0: i32, %arg1: memref<64x128xbf16, #tpu.memory_space<vmem>>, %arg2: memref<128x256xbf16, #tpu.memory_space<vmem>>, %arg3: memref<1x256xf32, #tpu.memory_space<vmem>>, %arg4: memref<256x512xbf16, #tpu.memory_space<vmem>>, %arg5: memref<1x512xf32, #tpu.memory_space<vmem>>, %arg6: memref<512x256xbf16, #tpu.memory_space<vmem>>, %arg7: memref<1x256xf32, #tpu.memory_space<vmem>>, %arg8: memref<64x256xbf16, #tpu.memory_space<vmem>>) attributes {dimension_semantics = [#tpu.dimension_semantics<parallel>], iteration_bounds = array<i64: 2>, scalar_prefetch = 0 : i64, scratch_operands = 0 : i64, tpu.core_type = #tpu.core_type<tc>, window_params = [{transform_indices = @transform_0, window_bounds = array<i64: 64, 128>}, {pipeline_mode = #tpu.pipeline_mode<synchronous>, transform_indices = @transform_1, window_bounds = array<i64: 128, 256>}, {pipeline_mode = #tpu.pipeline_mode<synchronous>, transform_indices = @transform_2, window_bounds = array<i64: 1, 256>}, {pipeline_mode = #tpu.pipeline_mode<synchronous>, transform_indices = @transform_3, window_bounds = array<i64: 256, 512>}, {pipeline_mode = #tpu.pipeline_mode<synchronous>, transform_indices = @transform_4, window_bounds = array<i64: 1, 512>}, {pipeline_mode = #tpu.pipeline_mode<synchronous>, transform_indices = @transform_5, window_bounds = array<i64: 512, 256>}, {pipeline_mode = #tpu.pipeline_mode<synchronous>, transform_indices = @transform_6, window_bounds = array<i64: 1, 256>}, {transform_indices = @transform_7, window_bounds = array<i64: 64, 256>}]} {
    %c0 = arith.constant 0 : index
    %c0_0 = arith.constant 0 : index
    %0 = vector.load %arg1[%c0, %c0_0] : memref<64x128xbf16, #tpu.memory_space<vmem>>, vector<64x128xbf16>
    %c0_1 = arith.constant 0 : index
    %c0_2 = arith.constant 0 : index
    %1 = vector.load %arg2[%c0_1, %c0_2] : memref<128x256xbf16, #tpu.memory_space<vmem>>, vector<128x256xbf16>
    %cst = arith.constant dense<0.000000e+00> : vector<64x256xf32>
    %2 = tpu.matmul %0, %1, %cst {dimension_numbers = #tpu.dot_dimension_numbers<[1], [0], [0], [1], [0, 0, 1, 1], [], []>} : vector<64x128xbf16>, vector<128x256xbf16>, vector<64x256xf32> -> vector<64x256xf32>
    %c0_3 = arith.constant 0 : index
    %c0_4 = arith.constant 0 : index
    %3 = vector.load %arg3[%c0_3, %c0_4] : memref<1x256xf32, #tpu.memory_space<vmem>>, vector<1x256xf32>
    %4 = vector.broadcast %3 : vector<1x256xf32> to vector<64x256xf32>
    %5 = arith.addf %2, %4 : vector<64x256xf32>
    %cst_5 = arith.constant 0.000000e+00 : f32
    %6 = vector.broadcast %cst_5 : f32 to vector<64x256xf32>
    %7 = arith.maximumf %5, %6 : vector<64x256xf32>
    %8 = arith.truncf %7 : vector<64x256xf32> to vector<64x256xbf16>
    %c0_6 = arith.constant 0 : index
    %c0_7 = arith.constant 0 : index
    %9 = vector.load %arg4[%c0_6, %c0_7] : memref<256x512xbf16, #tpu.memory_space<vmem>>, vector<256x512xbf16>
    %cst_8 = arith.constant dense<0.000000e+00> : vector<64x512xf32>
    %10 = tpu.matmul %8, %9, %cst_8 {dimension_numbers = #tpu.dot_dimension_numbers<[1], [0], [0], [1], [0, 0, 1, 1], [], []>} : vector<64x256xbf16>, vector<256x512xbf16>, vector<64x512xf32> -> vector<64x512xf32>
    %c0_9 = arith.constant 0 : index
    %c0_10 = arith.constant 0 : index
    %11 = vector.load %arg5[%c0_9, %c0_10] : memref<1x512xf32, #tpu.memory_space<vmem>>, vector<1x512xf32>
    %12 = vector.broadcast %11 : vector<1x512xf32> to vector<64x512xf32>
    %13 = arith.addf %10, %12 : vector<64x512xf32>
    %cst_11 = arith.constant 0.000000e+00 : f32
    %14 = vector.broadcast %cst_11 : f32 to vector<64x512xf32>
    %15 = arith.maximumf %13, %14 : vector<64x512xf32>
    %16 = arith.truncf %15 : vector<64x512xf32> to vector<64x512xbf16>
    %c0_12 = arith.constant 0 : index
    %c0_13 = arith.constant 0 : index
    %17 = vector.load %arg6[%c0_12, %c0_13] : memref<512x256xbf16, #tpu.memory_space<vmem>>, vector<512x256xbf16>
    %cst_14 = arith.constant dense<0.000000e+00> : vector<64x256xf32>
    %18 = tpu.matmul %16, %17, %cst_14 {dimension_numbers = #tpu.dot_dimension_numbers<[1], [0], [0], [1], [0, 0, 1, 1], [], []>} : vector<64x512xbf16>, vector<512x256xbf16>, vector<64x256xf32> -> vector<64x256xf32>
    %c0_15 = arith.constant 0 : index
    %c0_16 = arith.constant 0 : index
    %19 = vector.load %arg7[%c0_15, %c0_16] : memref<1x256xf32, #tpu.memory_space<vmem>>, vector<1x256xf32>
    %20 = vector.broadcast %19 : vector<1x256xf32> to vector<64x256xf32>
    %21 = arith.addf %18, %20 : vector<64x256xf32>
    %22 = arith.negf %21 : vector<64x256xf32>
    %23 = math.exp %22 : vector<64x256xf32>
    %cst_17 = arith.constant 1.000000e+00 : f32
    %24 = vector.broadcast %cst_17 : f32 to vector<64x256xf32>
    %25 = arith.addf %24, %23 : vector<64x256xf32>
    %26 = arith.divf %24, %25 : vector<64x256xf32>
    %27 = arith.truncf %26 : vector<64x256xf32> to vector<64x256xbf16>
    %c0_18 = arith.constant 0 : index
    %c0_19 = arith.constant 0 : index
    %28 = vector.load %arg8[%c0_18, %c0_19] : memref<64x256xbf16, #tpu.memory_space<vmem>>, vector<64x256xbf16>
    tpu.vector_store %arg8[%c0_18, %c0_19], %27 {strides = array<i32>} : memref<64x256xbf16, #tpu.memory_space<vmem>>, vector<64x256xbf16>,
    return
  }
  func.func @transform_0(%arg0: i32) -> (i32, i32) {
    %c0_i32 = arith.constant 0 : i32
    %c0_i32_0 = arith.constant 0 : i32
    return %arg0, %c0_i32 : i32, i32
  }
  func.func @transform_1(%arg0: i32) -> (i32, i32) {
    %c0_i32 = arith.constant 0 : i32
    %c0_i32_0 = arith.constant 0 : i32
    %c0_i32_1 = arith.constant 0 : i32
    return %c0_i32, %c0_i32_0 : i32, i32
  }
  func.func @transform_2(%arg0: i32) -> (i32, i32) {
    %c0_i32 = arith.constant 0 : i32
    %c0_i32_0 = arith.constant 0 : i32
    %c0_i32_1 = arith.constant 0 : i32
    return %c0_i32, %c0_i32_0 : i32, i32
  }
  func.func @transform_3(%arg0: i32) -> (i32, i32) {
    %c0_i32 = arith.constant 0 : i32
    %c0_i32_0 = arith.constant 0 : i32
    %c0_i32_1 = arith.constant 0 : i32
    return %c0_i32, %c0_i32_0 : i32, i32
  }
  func.func @transform_4(%arg0: i32) -> (i32, i32) {
    %c0_i32 = arith.constant 0 : i32
    %c0_i32_0 = arith.constant 0 : i32
    %c0_i32_1 = arith.constant 0 : i32
    return %c0_i32, %c0_i32_0 : i32, i32
  }
  func.func @transform_5(%arg0: i32) -> (i32, i32) {
    %c0_i32 = arith.constant 0 : i32
    %c0_i32_0 = arith.constant 0 : i32
    %c0_i32_1 = arith.constant 0 : i32
    return %c0_i32, %c0_i32_0 : i32, i32
  }
  func.func @transform_6(%arg0: i32) -> (i32, i32) {
    %c0_i32 = arith.constant 0 : i32
    %c0_i32_0 = arith.constant 0 : i32
    %c0_i32_1 = arith.constant 0 : i32
    return %c0_i32, %c0_i32_0 : i32, i32
  }
  func.func @transform_7(%arg0: i32) -> (i32, i32) {
    %c0_i32 = arith.constant 0 : i32
    %c0_i32_0 = arith.constant 0 : i32
    return %arg0, %c0_i32 : i32, i32
  }
}

</mosaic_0001>

<bundles_post_ra>
// kernel: gen_forward.1
= control target key start
LH: loop header
LB: loop body
LE: loop exit
PB: predicated region body
PF: predicated region fallthrough
CT: control target
= control target key end

     0   :  { %12 = vsyncpa [#allocation3], 0  ;;  %s3160_s24 = smov 0   ;;  %s4133_s0 = inlined_call_operand.vmem [shape: bf16[128,128], index: 0, kind: input, shape index: {}]   ;;  %s4134_s1 = inlined_call_operand.vmem [shape: bf16[128,256], index: 1, kind: input, shape index: {}]   ;;  %s4135_s2 = inlined_call_operand.vmem [shape: f32[1,256], index: 2, kind: input, shape index: {}]   ;;  %s4136_s3 = inlined_call_operand.vmem [shape: bf16[256,512], index: 3, kind: input, shape index: {}]   ;;  %s4137_s4 = inlined_call_operand.vmem [shape: f32[1,512], index: 4, kind: input, shape index: {}]   ;;  %s4138_s5 = inlined_call_operand.hbm [shape: bf16[512,256], index: 5, kind: input, shape index: {}]   ;;  %s4139_s6 = inlined_call_operand.vmem [shape: f32[1,256], index: 6, kind: input, shape index: {}]   ;;  %s4140_s7 = inlined_call_operand.vmem [shape: bf16[128,256], index: 7, kind: output, shape index: {}]  }
   0x1 LB: > { %s224_s27 = sshll.u32 %s4138_s5, 4  ;;  %s2203_s28 = sadd.s32 4294967295, %s3115_s24   ;;  %s3115_s24 = sphi %s3160_s24, %s18_s24   ;;  %s225_s27 = int_to_ptr.hbm [resolvable:$true] %s224_s27 }
   0x2   : > { %p2205_p0 = scmp.ge.s32.totalorder %s3115_s24, 1  ;;  %p201_p1 = scmp.lt.s32.totalorder %s3115_s24, 3 }
   0x3   : > { %p2998_p2 = scmp.eq.s32.totalorder %s2203_s28, 0  ;;  %s3117_s29 = smov [#allocation2]  }
   0x4   : > { %p202_p3 = pnand %p2205_p0, %p201_p1  ;;  %s226_s30 = sshll.u32 %s3117_s29, 4  ;;  %s227_s30 = int_to_ptr.vmem [resolvable:$true] %s226_s30 }
   0x5   : > { %s3118_s8 = smov 128   ;;  %s3119_s9 = smov 8  }
   0x6   : > { %p2994_p4 = pneg %p202_p3  ;;  %254 = sbr.rel (%p202_p3) target bundleno = 679 (0x2a7), region = 48 }
   0x8   : > { %p2995_p5 = pnand %p2998_p2, %p2994_p4 }
   0xa   : > { %2997 = dma.hbm_to_vmem [thread:$0]  (!%p2995_p5), %s225_s27, 8192, %s227_s30, [#allocation3], %s3118_s8, %s3118_s8, %s3119_s9  }
   0xb   : > { %3110 = dma.done.wait (%p2998_p2), [#allocation3], 8192  }
   0xc   : > { %3112 = vsyncadd (%p2998_p2), [#allocation3], 4294959104  ;;  %v2289_v0 = vld [vmem:[%s4134_s1 + $0x70] sm:$0xf]  ;;  %v2845_v1 = vld [vmem:[%s4134_s1 + $0x74] sm:$0xf0] }
   0xd   : > { %v2844_v2 = vld [vmem:[%s4134_s1 + $0x74] sm:$0xf]  ;;  %v2290_v3 = vor.u32 %v2845_v1, %v2289_v0  ;;  %v2291_v4 = vld [vmem:[%s4134_s1 + $0x78] sm:$0xf0]  ;;  %v2281_v5 = vld [vmem:[%s4134_s1 + $0x60] sm:$0xf] }
   0xe   : > { %v2843_v6 = vld [vmem:[%s4134_s1 + $0x64] sm:$0xf0]  ;;  %v2294_v7 = vor.u32 %v2844_v2, %v2291_v4  ;;  %v2842_v8 = vld [vmem:[%s4134_s1 + $0x64] sm:$0xf]  ;;  %v2283_v9 = vld [vmem:[%s4134_s1 + $0x68] sm:$0xf0] }
   0xf   : > { %435 = vmatpush.bf16.msra.mxu0 %v2290_v3  ;;  %v2282_v10 = vor.u32 %v2843_v6, %v2281_v5  ;;  %2974 = vmatpush.bf16.msra.mxu2 %v2290_v3  ;;  %v2286_v11 = vor.u32 %v2842_v8, %v2283_v9  ;;  %v2273_v12 = vld [vmem:[%s4134_s1 + $0x50] sm:$0xf]  ;;  %v2841_v13 = vld [vmem:[%s4134_s1 + $0x54] sm:$0xf0]  ;;  %v2840_v14 = vld [vmem:[%s4134_s1 + $0x54] sm:$0xf] }
  0x10   : > { %464 = vmatpush.bf16.msra.mxu1 %v2294_v7  ;;  %2982 = vmatpush.bf16.msra.mxu3 %v2294_v7  ;;  %v2275_v15 = vld [vmem:[%s4134_s1 + $0x58] sm:$0xf0]  ;;  %v2274_v16 = vor.u32 %v2841_v13, %v2273_v12  ;;  %v2265_v18 = vld [vmem:[%s4134_s1 + $0x40] sm:$0xf]  ;;  %v2839_v19 = vld [vmem:[%s4134_s1 + $0x44] sm:$0xf0] }
  0x11   : > { %v2278_v17 = vor.u32 %v2840_v14, %v2275_v15  ;;  %v2838_v20 = vld [vmem:[%s4134_s1 + $0x44] sm:$0xf]  ;;  %v2267_v21 = vld [vmem:[%s4134_s1 + $0x48] sm:$0xf0]  ;;  %v2266_v22 = vor.u32 %v2839_v19, %v2265_v18  ;;  %s2210_s21 = sshll.u32 %s2203_s28, 3 }
  0x12   : > { %v2270_v23 = vor.u32 %v2838_v20, %v2267_v21  ;;  %v2257_v24 = vld [vmem:[%s4134_s1 + $0x30] sm:$0xf]  ;;  %v2837_v25 = vld [vmem:[%s4134_s1 + $0x34] sm:$0xf0]  ;;  %v2836_v26 = vld [vmem:[%s4134_s1 + $0x34] sm:$0xf] }
  0x13   : > { %436 = vmatpush.bf16.msra.mxu0 %v2282_v10  ;;  %2975 = vmatpush.bf16.msra.mxu2 %v2282_v10  ;;  %v2259_v27 = vld [vmem:[%s4134_s1 + $0x38] sm:$0xf0]  ;;  %p289_p6 = scmp.lt.s32.totalorder %s2210_s21, 15  ;;  %v2258_v28 = vor.u32 %v2837_v25, %v2257_v24  ;;  %v2249_v30 = vld [vmem:[%s4134_s1 + $0x20] sm:$0xf] }
  0x14   : > { %465 = vmatpush.bf16.msra.mxu1 %v2286_v11  ;;  %2983 = vmatpush.bf16.msra.mxu3 %v2286_v11  ;;  %v2262_v29 = vor.u32 %v2836_v26, %v2259_v27  ;;  %v2835_v31 = vld [vmem:[%s4134_s1 + $0x24] sm:$0xf0]  ;;  %v2834_v32 = vld [vmem:[%s4134_s1 + $0x24] sm:$0xf]  ;;  %v2251_v33 = vld [vmem:[%s4134_s1 + $0x28] sm:$0xf0] }
  0x15   : > { %s4164_s21 = smov (!%p289_p6, %s2210_s21), 15  ;;  %v2250_v34 = vor.u32 %v2835_v31, %v2249_v30  ;;  %v2254_v35 = vor.u32 %v2834_v32, %v2251_v33  ;;  %v2241_v36 = vld [vmem:[%s4134_s1 + $0x10] sm:$0xf]  ;;  %v2833_v37 = vld [vmem:[%s4134_s1 + $0x14] sm:$0xf0] }
  0x16   : > { %v2832_v38 = vld [vmem:[%s4134_s1 + $0x14] sm:$0xf]  ;;  %v2243_v39 = vld [vmem:[%s4134_s1 + $0x18] sm:$0xf0]  ;;  %s2211_s26 = sshll.u32 %s4164_s21, 2  ;;  %v2242_v40 = vor.u32 %v2833_v37, %v2241_v36  ;;  %s2825_s8 = sshll.u32 %s4164_s21, 3 }
  0x17   : > { %437 = vmatpush.bf16.msra.mxu0 %v2274_v16  ;;  %2976 = vmatpush.bf16.msra.mxu2 %v2274_v16  ;;  %v2246_v41 = vor.u32 %v2832_v38, %v2243_v39  ;;  %v2233_v42 = vld [vmem:[%s4134_s1] sm:$0xf]  ;;  %v2831_v43 = vld [vmem:[%s4134_s1 + $0x4] sm:$0xf0]  ;;  %v2830_v44 = vld [vmem:[%s4134_s1 + $0x4] sm:$0xf]  ;;  %s3277_s14 = scalar_lea.vmem %s4133_s0, %s2211_s26  ;;  %s3947_s28 = scalar_lea.vmem %s4140_s7, %s2825_s8 }
  0x18   : > { %466 = vmatpush.bf16.msra.mxu1 %v2278_v17  ;;  %2984 = vmatpush.bf16.msra.mxu3 %v2278_v17  ;;  %v2235_v45 = vld [vmem:[%s4134_s1 + $0x8] sm:$0xf0]  ;;  %v2409_v46 = vld [vmem:[%s4136_s3 + $0xe0] sm:$0xf]  ;;  %v2876_v47 = vld [vmem:[%s4136_s3 + $0xec] sm:$0xf0]  ;;  %v2234_v50 = vor.u32 %v2831_v43, %v2233_v42 }
  0x19   : > { %v2537_v48 = vld [vmem:[%s4136_s3 + $0x1e0] sm:$0xf]  ;;  %v2908_v49 = vld [vmem:[%s4136_s3 + $0x1ec] sm:$0xf0]  ;;  %v2238_v51 = vor.u32 %v2830_v44, %v2235_v45  ;;  %v2874_v54 = vld [vmem:[%s4136_s3 + $0xe4] sm:$0xf]  ;;  %v2410_v56 = vor.u32 %v2876_v47, %v2409_v46 }
  0x1a   : > { %v2826_v52 = vld [vmem:[%s3277_s14] sm:$0xff]  ;;  %v2828_v53 = vld [vmem:[%s3277_s14 + $0x10] sm:$0xff]  ;;  %v2538_v57 = vor.u32 %v2908_v49, %v2537_v48  ;;  %v2827_v37 = vld [vmem:[%s3277_s14 + $0x8] sm:$0xff] }
  0x1b   : > { %438 = vmatpush.bf16.msra.mxu0 %v2266_v22  ;;  %2977 = vmatpush.bf16.msra.mxu2 %v2266_v22  ;;  %v2411_v55 = vld [vmem:[%s4136_s3 + $0xf0] sm:$0xf0]  ;;  %v2906_v58 = vld [vmem:[%s4136_s3 + $0x1e4] sm:$0xf]  ;;  %v2393_v60 = vld [vmem:[%s4136_s3 + $0xc0] sm:$0xf] }
  0x1c   : > { %467 = vmatpush.bf16.msra.mxu1 %v2270_v23  ;;  %2985 = vmatpush.bf16.msra.mxu3 %v2270_v23  ;;  %v2539_v59 = vld [vmem:[%s4136_s3 + $0x1f0] sm:$0xf0]  ;;  %v2872_v61 = vld [vmem:[%s4136_s3 + $0xcc] sm:$0xf0]  ;;  %v2521_v62 = vld [vmem:[%s4136_s3 + $0x1c0] sm:$0xf]  ;;  %v2414_v0 = vor.u32 %v2874_v54, %v2411_v55 }
  0x1d   : > { %v2904_v63 = vld [vmem:[%s4136_s3 + $0x1cc] sm:$0xf0]  ;;  %v2542_v1 = vor.u32 %v2906_v58, %v2539_v59  ;;  %v2870_v2 = vld [vmem:[%s4136_s3 + $0xc4] sm:$0xf]  ;;  %v2395_v3 = vld [vmem:[%s4136_s3 + $0xd0] sm:$0xf0]  ;;  %v2394_v4 = vor.u32 %v2872_v61, %v2393_v60 }
  0x1e   : > { %v2522_v5 = vor.u32 %v2904_v63, %v2521_v62  ;;  %v2902_v6 = vld [vmem:[%s4136_s3 + $0x1c4] sm:$0xf]  ;;  %v2523_v7 = vld [vmem:[%s4136_s3 + $0x1d0] sm:$0xf0]  ;;  %v2377_v8 = vld [vmem:[%s4136_s3 + $0xa0] sm:$0xf]  ;;  %v2398_v12 = vor.u32 %v2870_v2, %v2395_v3 }
  0x1f   : > { %439 = vmatpush.bf16.msra.mxu0 %v2258_v28  ;;  %2978 = vmatpush.bf16.msra.mxu2 %v2258_v28  ;;  %v2868_v9 = vld [vmem:[%s4136_s3 + $0xac] sm:$0xf0]  ;;  %v2505_v10 = vld [vmem:[%s4136_s3 + $0x1a0] sm:$0xf]  ;;  %v2526_v13 = vor.u32 %v2902_v6, %v2523_v7  ;;  %v2866_v14 = vld [vmem:[%s4136_s3 + $0xa4] sm:$0xf] }
  0x20   : > { %468 = vmatpush.bf16.msra.mxu1 %v2262_v29  ;;  %2986 = vmatpush.bf16.msra.mxu3 %v2262_v29  ;;  %v2900_v11 = vld [vmem:[%s4136_s3 + $0x1ac] sm:$0xf0]  ;;  %v2379_v15 = vld [vmem:[%s4136_s3 + $0xb0] sm:$0xf0]  ;;  %v2378_v16 = vor.u32 %v2868_v9, %v2377_v8  ;;  %v2898_v18 = vld [vmem:[%s4136_s3 + $0x1a4] sm:$0xf] }
  0x21   : > { %v2506_v17 = vor.u32 %v2900_v11, %v2505_v10  ;;  %v2507_v19 = vld [vmem:[%s4136_s3 + $0x1b0] sm:$0xf0]  ;;  %v2361_v20 = vld [vmem:[%s4136_s3 + $0x80] sm:$0xf]  ;;  %v2864_v21 = vld [vmem:[%s4136_s3 + $0x8c] sm:$0xf0]  ;;  %v2382_v24 = vor.u32 %v2866_v14, %v2379_v15 }
  0x22   : > { %v2489_v22 = vld [vmem:[%s4136_s3 + $0x180] sm:$0xf]  ;;  %v2896_v23 = vld [vmem:[%s4136_s3 + $0x18c] sm:$0xf0]  ;;  %v2510_v25 = vor.u32 %v2898_v18, %v2507_v19  ;;  %v2862_v26 = vld [vmem:[%s4136_s3 + $0x84] sm:$0xf]  ;;  %v2362_v27 = vor.u32 %v2864_v21, %v2361_v20 }
  0x23   : > { %440 = vmatpush.bf16.msra.mxu0 %v2250_v34  ;;  %2979 = vmatpush.bf16.msra.mxu2 %v2250_v34  ;;  %v2490_v28 = vor.u32 %v2896_v23, %v2489_v22  ;;  %v2363_v29 = vld [vmem:[%s4136_s3 + $0x90] sm:$0xf0]  ;;  %v2894_v30 = vld [vmem:[%s4136_s3 + $0x184] sm:$0xf]  ;;  %v2345_v32 = vld [vmem:[%s4136_s3 + $0x60] sm:$0xf] }
  0x24   : > { %469 = vmatpush.bf16.msra.mxu1 %v2254_v35  ;;  %2987 = vmatpush.bf16.msra.mxu3 %v2254_v35  ;;  %v2491_v31 = vld [vmem:[%s4136_s3 + $0x190] sm:$0xf0]  ;;  %v2860_v33 = vld [vmem:[%s4136_s3 + $0x6c] sm:$0xf0]  ;;  %v2366_v34 = vor.u32 %v2862_v26, %v2363_v29  ;;  %v2829_v38 = vld [vmem:[%s3277_s14 + $0x18] sm:$0xff] }
  0x25   : > { %v2494_v35 = vor.u32 %v2894_v30, %v2491_v31  ;;  %v2346_v36 = vor.u32 %v2860_v33, %v2345_v32  ;;  %v2473_v39 = vld [vmem:[%s4136_s3 + $0x160] sm:$0xf]  ;;  %v2347_v43 = vld [vmem:[%s4136_s3 + $0x70] sm:$0xf0]  ;;  %v2890_v44 = vld [vmem:[%s4136_s3 + $0x164] sm:$0xf] }
  0x26   : > { %v2475_v45 = vld [vmem:[%s4136_s3 + $0x170] sm:$0xf0]  ;;  %v2329_v48 = vld [vmem:[%s4136_s3 + $0x40] sm:$0xf]  ;;  %v2856_v49 = vld [vmem:[%s4136_s3 + $0x4c] sm:$0xf0] }
  0x27   : > { %441 = vmatpush.bf16.msra.mxu0 %v2242_v40  ;;  %2980 = vmatpush.bf16.msra.mxu2 %v2242_v40  ;;  %v2892_v40 = vld [vmem:[%s4136_s3 + $0x16c] sm:$0xf0]  ;;  %v2478_v47 = vor.u32 %v2890_v44, %v2475_v45  ;;  %v2331_v55 = vld [vmem:[%s4136_s3 + $0x50] sm:$0xf0]  ;;  %v2313_v60 = vld [vmem:[%s4136_s3 + $0x20] sm:$0xf] }
  0x28   : > { %470 = vmatpush.bf16.msra.mxu1 %v2246_v41  ;;  %2988 = vmatpush.bf16.msra.mxu3 %v2246_v41  ;;  %v2858_v41 = vld [vmem:[%s4136_s3 + $0x64] sm:$0xf]  ;;  %v2474_v42 = vor.u32 %v2892_v40, %v2473_v39  ;;  %v2852_v61 = vld [vmem:[%s4136_s3 + $0x2c] sm:$0xf0]  ;;  %v2441_v63 = vld [vmem:[%s4136_s3 + $0x120] sm:$0xf] }
  0x29   : > { %v2350_v46 = vor.u32 %v2858_v41, %v2347_v43  ;;  %v2314_v62 = vor.u32 %v2852_v61, %v2313_v60  ;;  %v2315_v3 = vld [vmem:[%s4136_s3 + $0x30] sm:$0xf0]  ;;  %v2297_v8 = vld [vmem:[%s4136_s3] sm:$0xf]  ;;  %v2848_v9 = vld [vmem:[%s4136_s3 + $0xc] sm:$0xf0] }
  0x2a   : > { %v2425_v10 = vld [vmem:[%s4136_s3 + $0x100] sm:$0xf]  ;;  %v2298_v11 = vor.u32 %v2848_v9, %v2297_v8  ;;  %v2299_v14 = vld [vmem:[%s4136_s3 + $0x10] sm:$0xf0]  ;;  %v2417_v20 = vld [vmem:[%s4136_s3 + $0xe8] sm:$0xf] }
  0x2b   : > { %442 = vmatpush.bf16.msra.mxu0 %v2234_v50  ;;  %2981 = vmatpush.bf16.msra.mxu2 %v2234_v50  ;;  %v2330_v50 = vor.u32 %v2856_v49, %v2329_v48  ;;  %v2427_v18 = vld [vmem:[%s4136_s3 + $0x110] sm:$0xf0]  ;;  %v2877_v21 = vld [vmem:[%s4136_s3 + $0xf4] sm:$0xf0]  ;;  %v2545_v23 = vld [vmem:[%s4136_s3 + $0x1e8] sm:$0xf] }
  0x2c   : > { %471 = vmatpush.bf16.msra.mxu1 %v2238_v51  ;;  %2989 = vmatpush.bf16.msra.mxu3 %v2238_v51  ;;  %v2457_v51 = vld [vmem:[%s4136_s3 + $0x140] sm:$0xf]  ;;  %v2418_v22 = vor.u32 %v2877_v21, %v2417_v20  ;;  %v2419_v29 = vld [vmem:[%s4136_s3 + $0xf8] sm:$0xf0]  ;;  %v2529_v32 = vld [vmem:[%s4136_s3 + $0x1c8] sm:$0xf] }
  0x2d   : > { %v2905_v33 = vld [vmem:[%s4136_s3 + $0x1d4] sm:$0xf0]  ;;  %v2385_v40 = vld [vmem:[%s4136_s3 + $0xa8] sm:$0xf]  ;;  %v2403_v45 = vld [vmem:[%s4136_s3 + $0xd8] sm:$0xf0] }
  0x2e   : > { %443 = vmatmul.bf16.vlgmr.msra.gmra.mxu0 %v2826_v52  ;;  %453 = vmatmul.bf16.vlgmr.msra.gmra.mxu2 %v2828_v53  ;;  %v2869_v41 = vld [vmem:[%s4136_s3 + $0xb4] sm:$0xf0]  ;;  %v2497_v60 = vld [vmem:[%s4136_s3 + $0x188] sm:$0xf]  ;;  %v2371_v21 = vld [vmem:[%s4136_s3 + $0x98] sm:$0xf0] }
  0x2f   : > { %911 = vmatpush.bf16.msrb.mxu2 %v2410_v56  ;;  %472 = vmatmul.bf16.vlgmr.msra.gmra.mxu1 %v2826_v52  ;;  %v2888_v52 = vld [vmem:[%s4136_s3 + $0x14c] sm:$0xf0]  ;;  %v2886_v56 = vld [vmem:[%s4136_s3 + $0x144] sm:$0xf]  ;;  %v2386_v44 = vor.u32 %v2869_v41, %v2385_v40  ;;  %v2891_v40 = vld [vmem:[%s4136_s3 + $0x16c] sm:$0xf] }
  0x30   : > { %940 = vmatpush.bf16.msrb.mxu3 %v2538_v57  ;;  %969 = vmatpush.bf16.msrb.mxu0 %v2414_v0  ;;  %v2458_v54 = vor.u32 %v2888_v52, %v2457_v51  ;;  %v2459_v57 = vld [vmem:[%s4136_s3 + $0x150] sm:$0xf0]  ;;  %v2884_v0 = vld [vmem:[%s4136_s3 + $0x12c] sm:$0xf0]  ;;  %v2531_v51 = vld [vmem:[%s4136_s3 + $0x1d8] sm:$0xf0] }
  0x31   : > { %482 = vmatmul.bf16.vlgmr.msra.gmra.mxu3 %v2828_v53  ;;  %998 = vmatpush.bf16.msrb.mxu1 %v2542_v1  ;;  %v2854_v53 = vld [vmem:[%s4136_s3 + $0x44] sm:$0xf]  ;;  %v2462_v59 = vor.u32 %v2886_v56, %v2459_v57  ;;  %v2442_v2 = vor.u32 %v2884_v0, %v2441_v63  ;;  %v2369_v52 = vld [vmem:[%s4136_s3 + $0x88] sm:$0xf]  ;;  %v2867_v56 = vld [vmem:[%s4136_s3 + $0xac] sm:$0xf] }
  0x32   : > { %v2334_v58 = vor.u32 %v2854_v53, %v2331_v55  ;;  %v2850_v1 = vld [vmem:[%s4136_s3 + $0x24] sm:$0xf]  ;;  %v2865_v55 = vld [vmem:[%s4136_s3 + $0x94] sm:$0xf0]  ;;  %v2899_v63 = vld [vmem:[%s4136_s3 + $0x1ac] sm:$0xf] }
  0x33   : > { %912 = vmatpush.bf16.msrb.mxu2 %v2394_v4  ;;  %v2882_v4 = vld [vmem:[%s4136_s3 + $0x124] sm:$0xf]  ;;  %v2318_v6 = vor.u32 %v2850_v1, %v2315_v3  ;;  %v2515_v0 = vld [vmem:[%s4136_s3 + $0x1b8] sm:$0xf0] }
  0x34   : > { %941 = vmatpush.bf16.msrb.mxu3 %v2522_v5  ;;  %970 = vmatpush.bf16.msrb.mxu0 %v2398_v12  ;;  %v2443_v5 = vld [vmem:[%s4136_s3 + $0x130] sm:$0xf0]  ;;  %v2880_v12 = vld [vmem:[%s4136_s3 + $0x10c] sm:$0xf0]  ;;  %v2483_v41 = vld [vmem:[%s4136_s3 + $0x178] sm:$0xf0] }
  0x35   : > { %999 = vmatpush.bf16.msrb.mxu1 %v2526_v13  ;;  %v2446_v7 = vor.u32 %v2882_v4, %v2443_v5  ;;  %v2846_v13 = vld [vmem:[%s4136_s3 + $0x4] sm:$0xf]  ;;  %v2426_v15 = vor.u32 %v2880_v12, %v2425_v10 }
  0x37   : > { %913 = vmatpush.bf16.msrb.mxu2 %v2378_v16  ;;  %v2302_v16 = vor.u32 %v2846_v13, %v2299_v14 }
  0x38   : > { %942 = vmatpush.bf16.msrb.mxu3 %v2506_v17  ;;  %971 = vmatpush.bf16.msrb.mxu0 %v2382_v24  ;;  %v2878_v17 = vld [vmem:[%s4136_s3 + $0x104] sm:$0xf]  ;;  %v2909_v24 = vld [vmem:[%s4136_s3 + $0x1f4] sm:$0xf0] }
  0x39   : > { %1000 = vmatpush.bf16.msrb.mxu1 %v2510_v25  ;;  %v2430_v19 = vor.u32 %v2878_v17, %v2427_v18  ;;  %v2401_v25 = vld [vmem:[%s4136_s3 + $0xc8] sm:$0xf]  ;;  %v2546_v26 = vor.u32 %v2909_v24, %v2545_v23  ;;  %v2861_v17 = vld [vmem:[%s4136_s3 + $0x74] sm:$0xf0]  ;;  %v2863_v18 = vld [vmem:[%s4136_s3 + $0x8c] sm:$0xf] }
  0x3a   : > { %v2374_v23 = vor.u32 %v2863_v18, %v2371_v21  ;;  %v2893_v24 = vld [vmem:[%s4136_s3 + $0x174] sm:$0xf0]  ;;  %v2451_v18 = vld [vmem:[%s4136_s3 + $0x138] sm:$0xf0] }
  0x3b   : > { %914 = vmatpush.bf16.msrb.mxu2 %v2362_v27  ;;  %v2873_v27 = vld [vmem:[%s4136_s3 + $0xd4] sm:$0xf0] }
  0x3c   : > { %943 = vmatpush.bf16.msrb.mxu3 %v2490_v28  ;;  %972 = vmatpush.bf16.msrb.mxu0 %v2366_v34  ;;  %v2875_v28 = vld [vmem:[%s4136_s3 + $0xec] sm:$0xf]  ;;  %v2402_v30 = vor.u32 %v2873_v27, %v2401_v25  ;;  %v2499_v27 = vld [vmem:[%s4136_s3 + $0x198] sm:$0xf0] }
  0x3d   : > { %1001 = vmatpush.bf16.msrb.mxu1 %v2494_v35  ;;  %v2422_v31 = vor.u32 %v2875_v28, %v2419_v29  ;;  %v2907_v34 = vld [vmem:[%s4136_s3 + $0x1ec] sm:$0xf]  ;;  %v325_v35 = vld [vmem:[%s4135_s2] sm:$0x3]  ;;  %v2337_v28 = vld [vmem:[%s4136_s3 + $0x48] sm:$0xf] }
  0x3e   : > { %448 = vmatmul.bf16.gmra.mxu0 %v2827_v37  ;;  %458 = vmatmul.bf16.gmra.mxu2 %v2829_v38  ;;  %v3541_v53 = vperm.slane %v325_v35, 0  ;;  %v3549_v57 = vperm.slane %v325_v35, 1  ;;  %v2895_v25 = vld [vmem:[%s4136_s3 + $0x18c] sm:$0xf]  ;;  %v2355_v35 = vld [vmem:[%s4136_s3 + $0x78] sm:$0xf0] }
  0x3f   : > { %915 = vmatpush.bf16.msrb.mxu2 %v2346_v36  ;;  %477 = vmatmul.bf16.gmra.mxu1 %v2827_v37  ;;  %v2530_v36 = vor.u32 %v2905_v33, %v2529_v32  ;;  %v2547_v37 = vld [vmem:[%s4136_s3 + $0x1f8] sm:$0xf0]  ;;  %v2859_v32 = vld [vmem:[%s4136_s3 + $0x6c] sm:$0xf] }
  0x40   : > { %944 = vmatpush.bf16.msrb.mxu3 %v2474_v42  ;;  %973 = vmatpush.bf16.msrb.mxu0 %v2350_v46  ;;  %v2550_v39 = vor.u32 %v2907_v34, %v2547_v37  ;;  %v2871_v42 = vld [vmem:[%s4136_s3 + $0xcc] sm:$0xf]  ;;  %v2513_v46 = vld [vmem:[%s4136_s3 + $0x1a8] sm:$0xf]  ;;  %v2889_v37 = vld [vmem:[%s4136_s3 + $0x154] sm:$0xf0] }
  0x41   : > { %487 = vmatmul.bf16.gmra.mxu3 %v2829_v38  ;;  %1002 = vmatpush.bf16.msrb.mxu1 %v2478_v47  ;;  %v2901_v47 = vld [vmem:[%s4136_s3 + $0x1b4] sm:$0xf0]  ;;  %v2406_v48 = vor.u32 %v2871_v42, %v2403_v45 }
  0x42   : > { %v2514_v49 = vor.u32 %v2901_v47, %v2513_v46 }
  0x43   : > { %916 = vmatpush.bf16.msrb.mxu2 %v2330_v50  ;;  %v2903_v50 = vld [vmem:[%s4136_s3 + $0x1cc] sm:$0xf] }
  0x44   : > { %945 = vmatpush.bf16.msrb.mxu3 %v2458_v54  ;;  %974 = vmatpush.bf16.msrb.mxu0 %v2334_v58  ;;  %v2534_v54 = vor.u32 %v2903_v50, %v2531_v51  ;;  %v2370_v58 = vor.u32 %v2865_v55, %v2369_v52 }
  0x45   : > { %1003 = vmatpush.bf16.msrb.mxu1 %v2462_v59  ;;  %v2387_v59 = vld [vmem:[%s4136_s3 + $0xb8] sm:$0xf0] }
  0x46   : > { %v2390_v61 = vor.u32 %v2867_v56, %v2387_v59  ;;  %v2321_v59 = vld [vmem:[%s4136_s3 + $0x28] sm:$0xf] }
  0x47   : > { %917 = vmatpush.bf16.msrb.mxu2 %v2314_v62  ;;  %v2897_v62 = vld [vmem:[%s4136_s3 + $0x194] sm:$0xf0] }
  0x48   : > { %946 = vmatpush.bf16.msrb.mxu3 %v2442_v2  ;;  %975 = vmatpush.bf16.msrb.mxu0 %v2318_v6  ;;  %v2498_v1 = vor.u32 %v2897_v62, %v2497_v60  ;;  %v2518_v2 = vor.u32 %v2899_v63, %v2515_v0  ;;  %v2853_v60 = vld [vmem:[%s4136_s3 + $0x34] sm:$0xf0]  ;;  %v2339_v63 = vld [vmem:[%s4136_s3 + $0x58] sm:$0xf0]  ;;  %v2449_v0 = vld [vmem:[%s4136_s3 + $0x128] sm:$0xf] }
  0x49   : > { %1004 = vmatpush.bf16.msrb.mxu1 %v2446_v7  ;;  %v2322_v62 = vor.u32 %v2853_v60, %v2321_v59  ;;  %v2925_v59 = vld [vmem:[#allocation2 + $0x74] sm:$0xf0]  ;;  %v2657_v60 = vld [vmem:[#allocation2 + $0xd0] sm:$0xf] }
  0x4b   : > { %918 = vmatpush.bf16.msrb.mxu2 %v2298_v11 }
  0x4c   : > { %947 = vmatpush.bf16.msrb.mxu3 %v2426_v15  ;;  %976 = vmatpush.bf16.msrb.mxu0 %v2302_v16  ;;  %v2353_v16 = vld [vmem:[%s4136_s3 + $0x68] sm:$0xf] }
  0x4d   : > { %1005 = vmatpush.bf16.msrb.mxu1 %v2430_v19  ;;  %v2354_v20 = vor.u32 %v2861_v17, %v2353_v16 }
  0x4f   : > { %1027 = vmatpush.bf16.msra.mxu2 %v2418_v22  ;;  %v2481_v22 = vld [vmem:[%s4136_s3 + $0x168] sm:$0xf] }
  0x50   : > { %1056 = vmatpush.bf16.msra.mxu3 %v2546_v26  ;;  %1085 = vmatpush.bf16.msra.mxu0 %v2422_v31  ;;  %v2482_v26 = vor.u32 %v2893_v24, %v2481_v22  ;;  %v2857_v31 = vld [vmem:[%s4136_s3 + $0x54] sm:$0xf0] }
  0x51   : > { %1114 = vmatpush.bf16.msra.mxu1 %v2550_v39  ;;  %v2338_v34 = vor.u32 %v2857_v31, %v2337_v28  ;;  %v2435_v28 = vld [vmem:[%s4136_s3 + $0x118] sm:$0xf0] }
  0x53   : > { %1028 = vmatpush.bf16.msra.mxu2 %v2402_v30  ;;  %v2502_v30 = vor.u32 %v2895_v25, %v2499_v27  ;;  %v2847_v25 = vld [vmem:[%s4136_s3 + $0xc] sm:$0xf] }
  0x54   : > { %1057 = vmatpush.bf16.msra.mxu3 %v2530_v36  ;;  %1086 = vmatpush.bf16.msra.mxu0 %v2406_v48  ;;  %v2465_v36 = vld [vmem:[%s4136_s3 + $0x148] sm:$0xf]  ;;  %v2879_v27 = vld [vmem:[%s4136_s3 + $0x10c] sm:$0xf] }
  0x55   : > { %1115 = vmatpush.bf16.msra.mxu1 %v2534_v54  ;;  %v2466_v39 = vor.u32 %v2889_v37, %v2465_v36  ;;  %v2438_v36 = vor.u32 %v2879_v27, %v2435_v28  ;;  %v2927_v27 = vld [vmem:[#allocation2 + $0x84] sm:$0xf0] }
  0x57   : > { %1029 = vmatpush.bf16.msra.mxu2 %v2386_v44 }
  0x58   : > { %1058 = vmatpush.bf16.msra.mxu3 %v2514_v49  ;;  %1087 = vmatpush.bf16.msra.mxu0 %v2390_v61  ;;  %v2855_v61 = vld [vmem:[%s4136_s3 + $0x4c] sm:$0xf] }
  0x59   : > { %1116 = vmatpush.bf16.msra.mxu1 %v2518_v2  ;;  %v2885_v2 = vld [vmem:[%s4136_s3 + $0x134] sm:$0xf0] }
  0x5b   : > { %1030 = vmatpush.bf16.msra.mxu2 %v2370_v58 }
  0x5c   : > { %1059 = vmatpush.bf16.msra.mxu3 %v2498_v1  ;;  %1088 = vmatpush.bf16.msra.mxu0 %v2374_v23  ;;  %v2342_v1 = vor.u32 %v2855_v61, %v2339_v63  ;;  %v2937_v61 = vld [vmem:[#allocation2 + $0xd4] sm:$0xf0]  ;;  %v2923_v63 = vld [vmem:[#allocation2 + $0x64] sm:$0xf0] }
  0x5d   : > { %1117 = vmatpush.bf16.msra.mxu1 %v2502_v30 }
  0x5f   : > { %1031 = vmatpush.bf16.msra.mxu2 %v2354_v20  ;;  %v2881_v20 = vld [vmem:[%s4136_s3 + $0x114] sm:$0xf0] }
  0x60   : > { %1060 = vmatpush.bf16.msra.mxu3 %v2482_v26  ;;  %v2307_v26 = vld [vmem:[%s4136_s3 + $0x18] sm:$0xf0] }
  0x61   : > { %v2310_v30 = vor.u32 %v2847_v25, %v2307_v26  ;;  %v2617_v26 = vld [vmem:[#allocation2 + $0x80] sm:$0xf] }
  0x62   : > { %v2618_v28 = vor.u32 %v2927_v27, %v2617_v26  ;;  %v2967_v26 = vld [vmem:[#allocation2 + $0x1c4] sm:$0xf0] }
  0x63   : > { %1032 = vmatpush.bf16.msra.mxu2 %v2338_v34 }
  0x64   : > { %1061 = vmatpush.bf16.msra.mxu3 %v2466_v39 }
  0x67   : > { %1033 = vmatpush.bf16.msra.mxu2 %v2322_v62  ;;  %v2601_v62 = vld [vmem:[#allocation2 + $0x60] sm:$0xf] }
  0xab   : > { %v444_v38 = vpop.f32.mrf.mxu0 }
  0xac   : > { %v473_v43 = vpop.f32.mrf.mxu1  ;;  %v445_v3 = vadd.f32 %v444_v38, %v3541_v53  ;;  %v2358_v38 = vor.u32 %v2859_v32, %v2355_v35 }
  0xad   : > { %v474_v4 = vadd.f32 %v473_v43, %v3549_v57  ;;  %v2486_v43 = vor.u32 %v2891_v40, %v2483_v41 }
  0xae   : > { %v493_v9 = vmax.f32 %v445_v3, 0.0  ;;  %1089 = vmatpush.bf16.msra.mxu0 %v2358_v38  ;;  %v2887_v3 = vld [vmem:[%s4136_s3 + $0x14c] sm:$0xf] }
  0xaf   : > { %v494_v11 = vmax.f32 %v474_v4, 0.0  ;;  %1118 = vmatpush.bf16.msra.mxu1 %v2486_v43  ;;  %v2450_v4 = vor.u32 %v2885_v2, %v2449_v0  ;;  %v2658_v0 = vor.u32 %v2937_v61, %v2657_v60  ;;  %v2649_v2 = vld [vmem:[#allocation2 + $0xc0] sm:$0xf] }
  0xb1   : > { %v454_v29 = vpop.f32.mrf.mxu2  ;;  %1062 = vmatpush.bf16.msra.mxu3 %v2450_v4  ;;  %v2921_v4 = vld [vmem:[#allocation2 + $0x54] sm:$0xf0] }
  0xb2   : > { %1090 = vmatpush.bf16.msra.mxu0 %v2342_v1  ;;  %v2602_v1 = vor.u32 %v2923_v63, %v2601_v62  ;;  %v2953_v62 = vld [vmem:[#allocation2 + $0x154] sm:$0xf0] }
  0xb3   : > { %v446_v5 = vpop.f32.mrf.mxu0 }
  0xb4   : > { %v447_v6 = vadd.f32 %v446_v5, %v3541_v53  ;;  %v475_v7 = vpop.f32.mrf.mxu1  ;;  %v483_v33 = vpop.f32.mrf.mxu3  ;;  %v2467_v5 = vld [vmem:[%s4136_s3 + $0x158] sm:$0xf0] }
  0xb5   : > { %v476_v8 = vadd.f32 %v475_v7, %v3549_v57  ;;  %v2849_v7 = vld [vmem:[%s4136_s3 + $0x14] sm:$0xf0]  ;;  %v484_v21 = vadd.f32 %v483_v33, %v3549_v57 }
  0xb6   : > { %v495_v10 = vmax.f32 %v447_v6, 0.0  ;;  %v2305_v6 = vld [vmem:[%s4136_s3 + $0x8] sm:$0xf] }
  0xb7   : > { %v496_v12 = vmax.f32 %v476_v8, 0.0  ;;  %v2470_v8 = vor.u32 %v2887_v3, %v2467_v5  ;;  %v502_v34 = vmax.f32 %v484_v21, 0.0  ;;  %v2929_v21 = vld [vmem:[#allocation2 + $0x94] sm:$0xf0] }
  0xb8   : > { %v3570_v13 = vpack.c.bf16 %v495_v10, %v493_v9  ;;  %v2306_v9 = vor.u32 %v2849_v7, %v2305_v6  ;;  %v2851_v10 = vld [vmem:[%s4136_s3 + $0x2c] sm:$0xf]  ;;  %v2641_v6 = vld [vmem:[#allocation2 + $0xb0] sm:$0xf]  ;;  %v2933_v7 = vld [vmem:[#allocation2 + $0xb4] sm:$0xf0] }
  0xb9   : > { %v3572_v14 = vpack.c.bf16 %v496_v12, %v494_v11  ;;  %v456_v56 = vpop.f32.mrf.mxu2  ;;  %v2323_v11 = vld [vmem:[%s4136_s3 + $0x38] sm:$0xf0]  ;;  %v2883_v12 = vld [vmem:[%s4136_s3 + $0x12c] sm:$0xf]  ;;  %1119 = vmatpush.bf16.msra.mxu1 %v2470_v8  ;;  %v2642_v8 = vor.u32 %v2933_v7, %v2641_v6 }
  0xba   : > { %919 = vmatmul.bf16.vlgmr.msrb.gmra.mxu2 %v3570_v13  ;;  %977 = vmatmul.bf16.vlgmr.msrb.gmra.mxu0 %v3570_v13  ;;  %v457_v16 = vadd.f32 %v456_v56, %v3541_v53  ;;  %v2326_v17 = vor.u32 %v2851_v10, %v2323_v11  ;;  %v2454_v23 = vor.u32 %v2883_v12, %v2451_v18  ;;  %v2939_v56 = vld [vmem:[#allocation2 + $0xe4] sm:$0xf0]  ;;  %v2633_v12 = vld [vmem:[#allocation2 + $0xa0] sm:$0xf]  ;;  %v2917_v18 = vld [vmem:[#allocation2 + $0x34] sm:$0xf0] }
  0xbb   : > { %948 = vmatmul.bf16.vlgmr.msrb.gmra.mxu3 %v3572_v14  ;;  %1006 = vmatmul.bf16.vlgmr.msrb.gmra.mxu1 %v3572_v14  ;;  %v449_v15 = vpop.f32.mrf.mxu0  ;;  %v2919_v10 = vld [vmem:[#allocation2 + $0x44] sm:$0xf0] }
  0xbc   : > { %v478_v19 = vpop.f32.mrf.mxu1  ;;  %v450_v42 = vadd.f32 %v449_v15, %v3541_v53  ;;  %v485_v58 = vpop.f32.mrf.mxu3  ;;  %v455_v15 = vadd.f32 %v454_v29, %v3541_v53  ;;  %1034 = vmatpush.bf16.msra.mxu2 %v2306_v9  ;;  %1091 = vmatpush.bf16.msra.mxu0 %v2326_v17  ;;  %v503_v32 = vmax.f32 %v457_v16, 0.0  ;;  %v2585_v9 = vld [vmem:[#allocation2 + $0x40] sm:$0xf]  ;;  %v2577_v17 = vld [vmem:[#allocation2 + $0x30] sm:$0xf] }
  0xbd   : > { %v479_v44 = vadd.f32 %v478_v19, %v3549_v57  ;;  %v2433_v19 = vld [vmem:[%s4136_s3 + $0x108] sm:$0xf]  ;;  %v486_v22 = vadd.f32 %v485_v58, %v3549_v57  ;;  %1120 = vmatpush.bf16.msra.mxu1 %v2454_v23  ;;  %v2609_v58 = vld [vmem:[#allocation2 + $0x70] sm:$0xf]  ;;  %v2586_v11 = vor.u32 %v2919_v10, %v2585_v9  ;;  %v2569_v23 = vld [vmem:[#allocation2 + $0x20] sm:$0xf] }
  0xbe   : > { %v497_v49 = vmax.f32 %v450_v42, 0.0  ;;  %v2434_v24 = vor.u32 %v2881_v20, %v2433_v19  ;;  %v501_v31 = vmax.f32 %v455_v15, 0.0  ;;  %v2931_v15 = vld [vmem:[#allocation2 + $0xa4] sm:$0xf0]  ;;  %v2578_v19 = vor.u32 %v2917_v18, %v2577_v17  ;;  %v2625_v20 = vld [vmem:[#allocation2 + $0x90] sm:$0xf] }
  0xbf   : > { %v498_v51 = vmax.f32 %v479_v44, 0.0  ;;  %v504_v35 = vmax.f32 %v486_v22, 0.0  ;;  %v2634_v16 = vor.u32 %v2931_v15, %v2633_v12  ;;  %v2626_v22 = vor.u32 %v2929_v21, %v2625_v20  ;;  %v2940_v9 = vld [vmem:[#allocation2 + $0xf4] sm:$0xf]  ;;  %v2675_v10 = vld [vmem:[#allocation2 + $0xf8] sm:$0xf0] }
  0xc0   : > { %1063 = vmatpush.bf16.msra.mxu3 %v2434_v24  ;;  %1092 = vmatpush.bf16.msra.mxu0 %v2310_v30  ;;  %v3702_v37 = vpack.c.bf16 %v503_v32, %v501_v31  ;;  %v2915_v24 = vld [vmem:[#allocation2 + $0x24] sm:$0xf0]  ;;  %v2913_v30 = vld [vmem:[#allocation2 + $0x14] sm:$0xf0]  ;;  %v2553_v32 = vld [vmem:[#allocation2] sm:$0xf]  ;;  %v2678_v15 = vor.u32 %v2940_v9, %v2675_v10 }
  0xc1   : > { %v459_v29 = vpop.f32.mrf.mxu2  ;;  %v3704_v38 = vpack.c.bf16 %v504_v35, %v502_v34  ;;  %1121 = vmatpush.bf16.msra.mxu1 %v2438_v36  ;;  %v2570_v25 = vor.u32 %v2915_v24, %v2569_v23  ;;  %v2737_v35 = vld [vmem:[#allocation2 + $0x170] sm:$0xf]  ;;  %v2957_v36 = vld [vmem:[#allocation2 + $0x174] sm:$0xf0]  ;;  %v2713_v18 = vld [vmem:[#allocation2 + $0x140] sm:$0xf] }
  0xc2   : > { %v460_v41 = vadd.f32 %v459_v29, %v3541_v53  ;;  %v2561_v29 = vld [vmem:[#allocation2 + $0x10] sm:$0xf]  ;;  %v2938_v21 = vld [vmem:[#allocation2 + $0xe4] sm:$0xf]  ;;  %v2587_v10 = vld [vmem:[#allocation2 + $0x48] sm:$0xf0] }
  0xc3   : > { %v451_v45 = vpop.f32.mrf.mxu0  ;;  %v2562_v31 = vor.u32 %v2913_v30, %v2561_v29  ;;  %v2924_v30 = vld [vmem:[#allocation2 + $0x74] sm:$0xf]  ;;  %v2918_v9 = vld [vmem:[#allocation2 + $0x44] sm:$0xf] }
  0xc4   : > { %v452_v46 = vadd.f32 %v451_v45, %v3541_v53  ;;  %v480_v47 = vpop.f32.mrf.mxu1  ;;  %v488_v33 = vpop.f32.mrf.mxu3  ;;  %v505_v45 = vmax.f32 %v460_v41, 0.0 }
  0xc5   : > { %v481_v48 = vadd.f32 %v480_v47, %v3549_v57  ;;  %v489_v43 = vadd.f32 %v488_v33, %v3549_v57  ;;  %v2911_v33 = vld [vmem:[#allocation2 + $0x4] sm:$0xf0] }
  0xc6   : > { %v499_v50 = vmax.f32 %v452_v46, 0.0  ;;  %v2554_v34 = vor.u32 %v2911_v33, %v2553_v32 }
  0xc7   : > { %v500_v52 = vmax.f32 %v481_v48, 0.0  ;;  %v506_v47 = vmax.f32 %v489_v43, 0.0 }
  0xc8   : > { %v3630_v54 = vpack.c.bf16 %v499_v50, %v497_v49 }
  0xc9   : > { %v3632_v55 = vpack.c.bf16 %v500_v52, %v498_v51  ;;  %v461_v39 = vpop.f32.mrf.mxu2  ;;  %v2665_v52 = vld [vmem:[#allocation2 + $0xe0] sm:$0xf] }
  0xca   : > { %924 = vmatmul.bf16.gmra.mxu2 %v3630_v54  ;;  %982 = vmatmul.bf16.gmra.mxu0 %v3630_v54  ;;  %v462_v42 = vadd.f32 %v461_v39, %v3541_v53  ;;  %v2673_v53 = vld [vmem:[#allocation2 + $0xf0] sm:$0xf]  ;;  %v2973_v39 = vld [vmem:[#allocation2 + $0x1f4] sm:$0xf0] }
  0xcb   : > { %953 = vmatmul.bf16.gmra.mxu3 %v3632_v55  ;;  %1011 = vmatmul.bf16.gmra.mxu1 %v3632_v55 }
  0xcc   : > { %v490_v40 = vpop.f32.mrf.mxu3  ;;  %v507_v46 = vmax.f32 %v462_v42, 0.0 }
  0xcd   : > { %v491_v44 = vadd.f32 %v490_v40, %v3549_v57  ;;  %v2941_v57 = vld [vmem:[#allocation2 + $0xf4] sm:$0xf0]  ;;  %v3741_v40 = vld [vmem:[%s4137_s4] sm:$0xf] }
  0xce   : > { %v3714_v49 = vpack.c.bf16 %v507_v46, %v505_v45  ;;  %v2674_v51 = vor.u32 %v2941_v57, %v2673_v53  ;;  %v3744_v43 = vperm.slane %v3741_v40, 1  ;;  %v2729_v45 = vld [vmem:[#allocation2 + $0x160] sm:$0xf]  ;;  %v2955_v46 = vld [vmem:[#allocation2 + $0x164] sm:$0xf0] }
  0xcf   : > { %v508_v48 = vmax.f32 %v491_v44, 0.0 }
  0xd0   : > { %1610 = vmatpush.bf16.msrb.mxu3 %v2674_v51  ;;  %v3748_v51 = vperm.slane %v3741_v40, 0 }
  0xd1   : > { %v3716_v50 = vpack.c.bf16 %v508_v48, %v506_v47  ;;  %v2730_v47 = vor.u32 %v2955_v46, %v2729_v45 }
  0xda   : > { %929 = vmatmul.bf16.gmra.mxu2 %v3702_v37  ;;  %987 = vmatmul.bf16.gmra.mxu0 %v3702_v37 }
  0xdb   : > { %958 = vmatmul.bf16.gmra.mxu3 %v3704_v38  ;;  %1016 = vmatmul.bf16.gmra.mxu1 %v3704_v38 }
  0xea   : > { %934 = vmatmul.bf16.gmra.mxu2 %v3714_v49  ;;  %992 = vmatmul.bf16.gmra.mxu0 %v3714_v49 }
  0xeb   : > { %963 = vmatmul.bf16.gmra.mxu3 %v3716_v50  ;;  %1021 = vmatmul.bf16.gmra.mxu1 %v3716_v50 }
  0xfa   : > { %1035 = vmatmul.bf16.vlgmr.msra.gmra.mxu2 %v3570_v13  ;;  %1093 = vmatmul.bf16.vlgmr.msra.gmra.mxu0 %v3570_v13  ;;  %v2666_v13 = vor.u32 %v2939_v56, %v2665_v52 }
  0xfb   : > { %1064 = vmatmul.bf16.vlgmr.msra.gmra.mxu3 %v3572_v14  ;;  %1122 = vmatmul.bf16.vlgmr.msra.gmra.mxu1 %v3572_v14  ;;  %v2610_v14 = vor.u32 %v2925_v59, %v2609_v58 }
  0xfc   : > { %1611 = vmatpush.bf16.msrb.mxu3 %v2666_v13 }
  0xfd   : > { %1581 = vmatpush.bf16.msrb.mxu2 %v2610_v14  ;;  %v2721_v14 = vld [vmem:[#allocation2 + $0x150] sm:$0xf] }
  0xfe   : > { %v2722_v63 = vor.u32 %v2953_v62, %v2721_v14  ;;  %v2920_v14 = vld [vmem:[#allocation2 + $0x54] sm:$0xf]  ;;  %v2595_v62 = vld [vmem:[#allocation2 + $0x58] sm:$0xf0] }
 0x100   : > { %1612 = vmatpush.bf16.msrb.mxu3 %v2658_v0 }
 0x101   : > { %1582 = vmatpush.bf16.msrb.mxu2 %v2602_v1 }
 0x10a   : > { %1040 = vmatmul.bf16.gmra.mxu2 %v3630_v54  ;;  %1098 = vmatmul.bf16.gmra.mxu0 %v3630_v54  ;;  %v2935_v54 = vld [vmem:[#allocation2 + $0xc4] sm:$0xf0] }
 0x10b   : > { %1069 = vmatmul.bf16.gmra.mxu3 %v3632_v55  ;;  %1127 = vmatmul.bf16.gmra.mxu1 %v3632_v55  ;;  %v2650_v3 = vor.u32 %v2935_v54, %v2649_v2  ;;  %v2593_v55 = vld [vmem:[#allocation2 + $0x50] sm:$0xf]  ;;  %v2969_v54 = vld [vmem:[#allocation2 + $0x1d4] sm:$0xf0] }
 0x10c   : > { %v2594_v5 = vor.u32 %v2921_v4, %v2593_v55  ;;  %v2785_v2 = vld [vmem:[#allocation2 + $0x1d0] sm:$0xf] }
 0x10d   : > { %1613 = vmatpush.bf16.msrb.mxu3 %v2650_v3  ;;  %v2786_v55 = vor.u32 %v2969_v54, %v2785_v2  ;;  %v2598_v54 = vor.u32 %v2920_v14, %v2595_v62 }
 0x10e   : > { %1583 = vmatpush.bf16.msrb.mxu2 %v2594_v5 }
 0x111   : > { %1614 = vmatpush.bf16.msrb.mxu3 %v2642_v8 }
 0x112   : > { %1584 = vmatpush.bf16.msrb.mxu2 %v2586_v11 }
 0x115   : > { %1615 = vmatpush.bf16.msrb.mxu3 %v2634_v16 }
 0x116   : > { %1585 = vmatpush.bf16.msrb.mxu2 %v2578_v19  ;;  %v2951_v19 = vld [vmem:[#allocation2 + $0x144] sm:$0xf0] }
 0x117   : > { %v2714_v20 = vor.u32 %v2951_v19, %v2713_v18  ;;  %v2761_v19 = vld [vmem:[#allocation2 + $0x1a0] sm:$0xf] }
 0x119   : > { %1616 = vmatpush.bf16.msrb.mxu3 %v2626_v22  ;;  %v2667_v22 = vld [vmem:[#allocation2 + $0xe8] sm:$0xf0] }
 0x11a   : > { %1045 = vmatmul.bf16.gmra.mxu2 %v3702_v37  ;;  %1103 = vmatmul.bf16.gmra.mxu0 %v3702_v37  ;;  %v2738_v37 = vor.u32 %v2957_v36, %v2737_v35  ;;  %v2670_v27 = vor.u32 %v2938_v21, %v2667_v22  ;;  %v2936_v35 = vld [vmem:[#allocation2 + $0xd4] sm:$0xf]  ;;  %v2659_v36 = vld [vmem:[#allocation2 + $0xd8] sm:$0xf0]  ;;  %v2930_v21 = vld [vmem:[#allocation2 + $0xa4] sm:$0xf] }
 0x11b   : > { %1074 = vmatmul.bf16.gmra.mxu3 %v3704_v38  ;;  %1132 = vmatmul.bf16.gmra.mxu1 %v3704_v38  ;;  %v2801_v38 = vld [vmem:[#allocation2 + $0x1f0] sm:$0xf] }
 0x11c   : > { %1586 = vmatpush.bf16.msrb.mxu2 %v2570_v25  ;;  %1639 = vmatpush.bf16.msrb.mxu0 %v2738_v37  ;;  %v2802_v41 = vor.u32 %v2973_v39, %v2801_v38  ;;  %v2777_v25 = vld [vmem:[#allocation2 + $0x1c0] sm:$0xf] }
 0x11d   : > { %1617 = vmatpush.bf16.msrb.mxu3 %v2618_v28  ;;  %v2778_v29 = vor.u32 %v2967_v26, %v2777_v25  ;;  %v2635_v26 = vld [vmem:[#allocation2 + $0xa8] sm:$0xf0] }
 0x11e   : > { %1668 = vmatpush.bf16.msrb.mxu1 %v2802_v41  ;;  %v2662_v41 = vor.u32 %v2936_v35, %v2659_v36  ;;  %v2961_v35 = vld [vmem:[#allocation2 + $0x194] sm:$0xf0]  ;;  %v2928_v36 = vld [vmem:[#allocation2 + $0x94] sm:$0xf] }
 0x120   : > { %1587 = vmatpush.bf16.msrb.mxu2 %v2562_v31  ;;  %1640 = vmatpush.bf16.msrb.mxu0 %v2730_v47  ;;  %v2611_v31 = vld [vmem:[#allocation2 + $0x78] sm:$0xf0]  ;;  %v2705_v47 = vld [vmem:[#allocation2 + $0x130] sm:$0xf] }
 0x121   : > { %1726 = vmatpush.bf16.msra.mxu3 %v2678_v15  ;;  %v2614_v33 = vor.u32 %v2924_v30, %v2611_v31  ;;  %v2697_v15 = vld [vmem:[#allocation2 + $0x120] sm:$0xf]  ;;  %v2579_v30 = vld [vmem:[#allocation2 + $0x38] sm:$0xf0] }
 0x124   : > { %1588 = vmatpush.bf16.msrb.mxu2 %v2554_v34  ;;  %1641 = vmatpush.bf16.msrb.mxu0 %v2722_v63 }
 0x125   : > { %1727 = vmatpush.bf16.msra.mxu3 %v2670_v27 }
 0x128   : > { %1642 = vmatpush.bf16.msrb.mxu0 %v2714_v20  ;;  %1697 = vmatpush.bf16.msra.mxu2 %v2614_v33  ;;  %v2963_v20 = vld [vmem:[#allocation2 + $0x1a4] sm:$0xf0] }
 0x129   : > { %1728 = vmatpush.bf16.msra.mxu3 %v2662_v41  ;;  %v2762_v25 = vor.u32 %v2963_v20, %v2761_v19 }
 0x12a   : > { %1050 = vmatmul.bf16.gmra.mxu2 %v3714_v49  ;;  %1108 = vmatmul.bf16.gmra.mxu0 %v3714_v49  ;;  %v2793_v49 = vld [vmem:[#allocation2 + $0x1e0] sm:$0xf] }
 0x12b   : > { %1079 = vmatmul.bf16.gmra.mxu3 %v3716_v50  ;;  %1137 = vmatmul.bf16.gmra.mxu1 %v3716_v50  ;;  %v2971_v50 = vld [vmem:[#allocation2 + $0x1e4] sm:$0xf0] }
 0x12c   : > { %v2794_v57 = vor.u32 %v2971_v50, %v2793_v49 }
 0x12e   : > { %1669 = vmatpush.bf16.msrb.mxu1 %v2794_v57  ;;  %v2651_v57 = vld [vmem:[#allocation2 + $0xc8] sm:$0xf0] }
 0x132   : > { %1670 = vmatpush.bf16.msrb.mxu1 %v2786_v55  ;;  %v2932_v55 = vld [vmem:[#allocation2 + $0xb4] sm:$0xf] }
 0x136   : > { %1671 = vmatpush.bf16.msrb.mxu1 %v2778_v29  ;;  %v2916_v29 = vld [vmem:[#allocation2 + $0x34] sm:$0xf] }
 0x137   : > { %v978_v42 = vpop.f32.mrf.mxu0 }
 0x138   : > { %v1007_v44 = vpop.f32.mrf.mxu1  ;;  %v979_v48 = vadd.f32 %v978_v42, %v3744_v43  ;;  %v2922_v42 = vld [vmem:[#allocation2 + $0x64] sm:$0xf] }
 0x13a   : > { %v1008_v58 = vadd.f32 %v1007_v44, %v979_v48  ;;  %v2603_v44 = vld [vmem:[#allocation2 + $0x68] sm:$0xf0]  ;;  %v2949_v48 = vld [vmem:[#allocation2 + $0x134] sm:$0xf0] }
 0x13b   : > { %v2606_v49 = vor.u32 %v2922_v42, %v2603_v44  ;;  %v2706_v50 = vor.u32 %v2949_v48, %v2705_v47  ;;  %v2627_v42 = vld [vmem:[#allocation2 + $0x98] sm:$0xf0] }
 0x13c   : > { %v1144_v0 = vmax.f32 %v1008_v58, 0.0  ;;  %v2769_v58 = vld [vmem:[#allocation2 + $0x1b0] sm:$0xf]  ;;  %v2630_v44 = vor.u32 %v2928_v36, %v2627_v42  ;;  %v2972_v36 = vld [vmem:[#allocation2 + $0x1f4] sm:$0xf] }
 0x13d   : > { %v920_v53 = vpop.f32.mrf.mxu2  ;;  %1698 = vmatpush.bf16.msra.mxu2 %v2606_v49  ;;  %1643 = vmatpush.bf16.msrb.mxu0 %v2706_v50  ;;  %v2689_v49 = vld [vmem:[#allocation2 + $0x110] sm:$0xf]  ;;  %v2945_v50 = vld [vmem:[#allocation2 + $0x114] sm:$0xf0] }
 0x13e   : > { %v949_v52 = vpop.f32.mrf.mxu3  ;;  %v921_v60 = vadd.f32 %v920_v53, %v3748_v51  ;;  %v2934_v53 = vld [vmem:[#allocation2 + $0xc4] sm:$0xf] }
 0x13f   : > { %v980_v56 = vpop.f32.mrf.mxu0 }
 0x140   : > { %v981_v13 = vadd.f32 %v980_v56, %v3744_v43  ;;  %v1009_v59 = vpop.f32.mrf.mxu1  ;;  %v950_v4 = vadd.f32 %v949_v52, %v921_v60 }
 0x141   : > { %1699 = vmatpush.bf16.msra.mxu2 %v2598_v54 }
 0x142   : > { %v1010_v61 = vadd.f32 %v1009_v59, %v981_v13  ;;  %v1143_v16 = vmax.f32 %v950_v4, 0.0  ;;  %v2965_v13 = vld [vmem:[#allocation2 + $0x1b4] sm:$0xf0]  ;;  %v2654_v59 = vor.u32 %v2934_v53, %v2651_v57  ;;  %v2643_v4 = vld [vmem:[#allocation2 + $0xb8] sm:$0xf0]  ;;  %v2690_v57 = vor.u32 %v2945_v50, %v2689_v49 }
 0x144   : > { %v1148_v1 = vmax.f32 %v1010_v61, 0.0  ;;  %v2770_v61 = vor.u32 %v2965_v13, %v2769_v58  ;;  %1729 = vmatpush.bf16.msra.mxu3 %v2654_v59  ;;  %v2926_v58 = vld [vmem:[#allocation2 + $0x84] sm:$0xf] }
 0x145   : > { %v922_v3 = vpop.f32.mrf.mxu2 }
 0x146   : > { %v3752_v5 = vpack.c.bf16 %v1148_v1, %v1144_v0  ;;  %v923_v6 = vadd.f32 %v922_v3, %v3748_v51  ;;  %v951_v7 = vpop.f32.mrf.mxu3  ;;  %1672 = vmatpush.bf16.msrb.mxu1 %v2770_v61  ;;  %v2619_v61 = vld [vmem:[#allocation2 + $0x88] sm:$0xf0] }
 0x147   : > { %v983_v8 = vpop.f32.mrf.mxu0  ;;  %v2622_v62 = vor.u32 %v2926_v58, %v2619_v61  ;;  %v2970_v58 = vld [vmem:[#allocation2 + $0x1e4] sm:$0xf]  ;;  %v3793_v61 = vperm.slane %v3741_v40, 2 }
 0x148   : > { %v952_v11 = vadd.f32 %v951_v7, %v923_v6  ;;  %v1012_v12 = vpop.f32.mrf.mxu1  ;;  %1618 = vmatmul.bf16.vlgmr.msrb.gmra.mxu3 %v3752_v5  ;;  %v984_v24 = vadd.f32 %v983_v8, %v3744_v43  ;;  %v2646_v8 = vor.u32 %v2932_v55, %v2643_v4 }
 0x14a   : > { %v1147_v17 = vmax.f32 %v952_v11, 0.0  ;;  %v1013_v37 = vadd.f32 %v1012_v12, %v984_v24  ;;  %1730 = vmatpush.bf16.msra.mxu3 %v2646_v8  ;;  %1673 = vmatpush.bf16.msrb.mxu1 %v2762_v25 }
 0x14c   : > { %v3756_v23 = vpack.c.bf16 %v1147_v17, %v1143_v16  ;;  %v1152_v52 = vmax.f32 %v1013_v37, 0.0  ;;  %v2947_v16 = vld [vmem:[#allocation2 + $0x124] sm:$0xf0]  ;;  %v2590_v17 = vor.u32 %v2918_v9, %v2587_v10  ;;  %v2681_v9 = vld [vmem:[#allocation2 + $0x100] sm:$0xf] }
 0x14d   : > { %v925_v28 = vpop.f32.mrf.mxu2  ;;  %v2698_v18 = vor.u32 %v2947_v16, %v2697_v15  ;;  %v2943_v10 = vld [vmem:[#allocation2 + $0x104] sm:$0xf0] }
 0x14e   : > { %v954_v32 = vpop.f32.mrf.mxu3  ;;  %1589 = vmatmul.bf16.vlgmr.msrb.gmra.mxu2 %v3756_v23  ;;  %v926_v45 = vadd.f32 %v925_v28, %v3748_v51  ;;  %v2638_v28 = vor.u32 %v2930_v21, %v2635_v26  ;;  %v2682_v16 = vor.u32 %v2943_v10, %v2681_v9 }
 0x14f   : > { %v985_v34 = vpop.f32.mrf.mxu0  ;;  %1700 = vmatpush.bf16.msra.mxu2 %v2590_v17  ;;  %1644 = vmatpush.bf16.msrb.mxu0 %v2698_v18  ;;  %v2555_v17 = vld [vmem:[#allocation2 + $0x8] sm:$0xf0] }
 0x150   : > { %v986_v38 = vadd.f32 %v985_v34, %v3744_v43  ;;  %v1014_v39 = vpop.f32.mrf.mxu1  ;;  %v955_v63 = vadd.f32 %v954_v32, %v926_v45  ;;  %v2582_v32 = vor.u32 %v2916_v29, %v2579_v30  ;;  %1731 = vmatpush.bf16.msra.mxu3 %v2638_v28  ;;  %v2753_v34 = vld [vmem:[#allocation2 + $0x190] sm:$0xf]  ;;  %v2914_v45 = vld [vmem:[#allocation2 + $0x24] sm:$0xf] }
 0x151   : > { %v2754_v41 = vor.u32 %v2961_v35, %v2753_v34 }
 0x152   : > { %v1015_v46 = vadd.f32 %v1014_v39, %v986_v38  ;;  %v1151_v11 = vmax.f32 %v955_v63, 0.0  ;;  %v2912_v63 = vld [vmem:[#allocation2 + $0x14] sm:$0xf] }
 0x153   : > { %1701 = vmatpush.bf16.msra.mxu2 %v2582_v32  ;;  %1674 = vmatpush.bf16.msrb.mxu1 %v2754_v41  ;;  %v2739_v32 = vld [vmem:[#allocation2 + $0x178] sm:$0xf0] }
 0x154   : > { %v1156_v56 = vmax.f32 %v1015_v46, 0.0  ;;  %v2571_v46 = vld [vmem:[#allocation2 + $0x28] sm:$0xf0]  ;;  %1732 = vmatpush.bf16.msra.mxu3 %v2630_v44  ;;  %1645 = vmatpush.bf16.msrb.mxu0 %v2690_v57 }
 0x155   : > { %v927_v60 = vpop.f32.mrf.mxu2  ;;  %v2574_v53 = vor.u32 %v2914_v45, %v2571_v46  ;;  %v2731_v57 = vld [vmem:[#allocation2 + $0x168] sm:$0xf0] }
 0x156   : > { %v928_v0 = vadd.f32 %v927_v60, %v3748_v51  ;;  %v956_v1 = vpop.f32.mrf.mxu3  ;;  %v3763_v2 = vpack.c.bf16 %v1156_v56, %v1152_v52  ;;  %v2745_v52 = vld [vmem:[#allocation2 + $0x180] sm:$0xf]  ;;  %v2959_v56 = vld [vmem:[#allocation2 + $0x184] sm:$0xf0] }
 0x157   : > { %v988_v3 = vpop.f32.mrf.mxu0  ;;  %1702 = vmatpush.bf16.msra.mxu2 %v2574_v53  ;;  %v2746_v60 = vor.u32 %v2959_v56, %v2745_v52  ;;  %v2954_v53 = vld [vmem:[#allocation2 + $0x164] sm:$0xf] }
 0x158   : > { %v957_v6 = vadd.f32 %v956_v1, %v928_v0  ;;  %v1017_v7 = vpop.f32.mrf.mxu1  ;;  %1623 = vmatmul.bf16.gmra.mxu3 %v3763_v2  ;;  %v989_v22 = vadd.f32 %v988_v3, %v3744_v43  ;;  %v2563_v0 = vld [vmem:[#allocation2 + $0x18] sm:$0xf0]  ;;  %1646 = vmatpush.bf16.msrb.mxu0 %v2682_v16  ;;  %v2734_v52 = vor.u32 %v2954_v53, %v2731_v57  ;;  %v2968_v16 = vld [vmem:[#allocation2 + $0x1d4] sm:$0xf] }
 0x159   : > { %1675 = vmatpush.bf16.msrb.mxu1 %v2746_v60  ;;  %v2566_v4 = vor.u32 %v2912_v63, %v2563_v0  ;;  %1733 = vmatpush.bf16.msra.mxu3 %v2622_v62 }
 0x15a   : > { %v1155_v12 = vmax.f32 %v957_v6, 0.0  ;;  %v1018_v37 = vadd.f32 %v1017_v7, %v989_v22 }
 0x15b   : > { %1703 = vmatpush.bf16.msra.mxu2 %v2566_v4  ;;  %v2952_v4 = vld [vmem:[#allocation2 + $0x154] sm:$0xf] }
 0x15c   : > { %v3767_v24 = vpack.c.bf16 %v1155_v12, %v1151_v11  ;;  %v1160_v13 = vmax.f32 %v1018_v37, 0.0  ;;  %v2910_v11 = vld [vmem:[#allocation2 + $0x4] sm:$0xf]  ;;  %v2803_v37 = vld [vmem:[#allocation2 + $0x1f8] sm:$0xf0] }
 0x15d   : > { %v930_v27 = vpop.f32.mrf.mxu2  ;;  %v2558_v18 = vor.u32 %v2910_v11, %v2555_v17  ;;  %v2787_v17 = vld [vmem:[#allocation2 + $0x1d8] sm:$0xf0] }
 0x15e   : > { %v959_v31 = vpop.f32.mrf.mxu3  ;;  %1594 = vmatmul.bf16.gmra.mxu2 %v3767_v24  ;;  %v931_v47 = vadd.f32 %v930_v27, %v3748_v51 }
 0x15f   : > { %v990_v33 = vpop.f32.mrf.mxu0  ;;  %1704 = vmatpush.bf16.msra.mxu2 %v2558_v18 }
 0x160   : > { %v991_v38 = vadd.f32 %v990_v33, %v3744_v43  ;;  %v1019_v39 = vpop.f32.mrf.mxu1  ;;  %v960_v1 = vadd.f32 %v959_v31, %v931_v47  ;;  %v2956_v31 = vld [vmem:[#allocation2 + $0x174] sm:$0xf]  ;;  %v3786_v47 = vperm.slane %v3741_v40, 3 }
 0x161   : > { %v2742_v33 = vor.u32 %v2956_v31, %v2739_v32 }
 0x162   : > { %v1020_v48 = vadd.f32 %v1019_v39, %v991_v38  ;;  %v1159_v12 = vmax.f32 %v960_v1, 0.0  ;;  %v2806_v39 = vor.u32 %v2972_v36, %v2803_v37 }
 0x163   : > { %1755 = vmatpush.bf16.msra.mxu0 %v2742_v33  ;;  %v2966_v33 = vld [vmem:[#allocation2 + $0x1c4] sm:$0xf] }
 0x164   : > { %v1164_v59 = vmax.f32 %v1020_v48, 0.0  ;;  %1784 = vmatpush.bf16.msra.mxu1 %v2806_v39 }
 0x165   : > { %v932_v14 = vpop.f32.mrf.mxu2 }
 0x166   : > { %v933_v54 = vadd.f32 %v932_v14, %v3748_v51  ;;  %v961_v3 = vpop.f32.mrf.mxu3  ;;  %v3773_v55 = vpack.c.bf16 %v1164_v59, %v1160_v13  ;;  %v2795_v13 = vld [vmem:[#allocation2 + $0x1e8] sm:$0xf0] }
 0x167   : > { %v993_v6 = vpop.f32.mrf.mxu0  ;;  %1756 = vmatpush.bf16.msra.mxu0 %v2734_v52  ;;  %v2798_v60 = vor.u32 %v2970_v58, %v2795_v13  ;;  %v2771_v58 = vld [vmem:[#allocation2 + $0x1b8] sm:$0xf0] }
 0x168   : > { %v962_v7 = vadd.f32 %v961_v3, %v933_v54  ;;  %v1022_v8 = vpop.f32.mrf.mxu1  ;;  %1628 = vmatmul.bf16.gmra.mxu3 %v3773_v55  ;;  %v994_v19 = vadd.f32 %v993_v6, %v3744_v43  ;;  %v2723_v6 = vld [vmem:[#allocation2 + $0x158] sm:$0xf0] }
 0x169   : > { %1785 = vmatpush.bf16.msra.mxu1 %v2798_v60 }
 0x16a   : > { %v1163_v15 = vmax.f32 %v962_v7, 0.0  ;;  %v1023_v26 = vadd.f32 %v1022_v8, %v994_v19  ;;  %v2726_v7 = vor.u32 %v2952_v4, %v2723_v6  ;;  %v2790_v19 = vor.u32 %v2968_v16, %v2787_v17  ;;  %v2946_v4 = vld [vmem:[#allocation2 + $0x124] sm:$0xf]  ;;  %v2699_v6 = vld [vmem:[#allocation2 + $0x128] sm:$0xf0] }
 0x16b   : > { %v2755_v17 = vld [vmem:[#allocation2 + $0x198] sm:$0xf0] }
 0x16c   : > { %v3777_v20 = vpack.c.bf16 %v1163_v15, %v1159_v12  ;;  %v1168_v34 = vmax.f32 %v1023_v26, 0.0  ;;  %1757 = vmatpush.bf16.msra.mxu0 %v2726_v7 }
 0x16d   : > { %v935_v21 = vpop.f32.mrf.mxu2  ;;  %1786 = vmatpush.bf16.msra.mxu1 %v2790_v19 }
 0x16e   : > { %v964_v22 = vpop.f32.mrf.mxu3  ;;  %1599 = vmatmul.bf16.gmra.mxu2 %v3777_v20  ;;  %v936_v29 = vadd.f32 %v935_v21, %v3748_v51 }
 0x16f   : > { %v995_v25 = vpop.f32.mrf.mxu0 }
 0x170   : > { %v996_v27 = vadd.f32 %v995_v25, %v3744_v43  ;;  %v1024_v28 = vpop.f32.mrf.mxu1  ;;  %v965_v41 = vadd.f32 %v964_v22, %v936_v29  ;;  %v2950_v29 = vld [vmem:[#allocation2 + $0x144] sm:$0xf] }
 0x172   : > { %v1025_v30 = vadd.f32 %v1024_v28, %v996_v27  ;;  %v1167_v49 = vmax.f32 %v965_v41, 0.0 }
 0x174   : > { %v1172_v35 = vmax.f32 %v1025_v30, 0.0  ;;  %v2715_v30 = vld [vmem:[#allocation2 + $0x148] sm:$0xf0] }
 0x175   : > { %v937_v38 = vpop.f32.mrf.mxu2  ;;  %v2718_v32 = vor.u32 %v2950_v29, %v2715_v30  ;;  %v2683_v29 = vld [vmem:[#allocation2 + $0x108] sm:$0xf0] }
 0x176   : > { %v938_v42 = vadd.f32 %v937_v38, %v3748_v51  ;;  %v966_v44 = vpop.f32.mrf.mxu3  ;;  %v3783_v45 = vpack.c.bf16 %v1172_v35, %v1168_v34  ;;  %v2779_v34 = vld [vmem:[#allocation2 + $0x1c8] sm:$0xf0] }
 0x177   : > { %v1094_v43 = vpop.f32.mrf.mxu0  ;;  %v2782_v36 = vor.u32 %v2966_v33, %v2779_v34  ;;  %1758 = vmatpush.bf16.msra.mxu0 %v2718_v32 }
 0x178   : > { %v967_v46 = vadd.f32 %v966_v44, %v938_v42  ;;  %v1123_v48 = vpop.f32.mrf.mxu1  ;;  %1633 = vmatmul.bf16.gmra.mxu3 %v3783_v45  ;;  %v1095_v56 = vadd.f32 %v1094_v43, %v3786_v47  ;;  %v2948_v44 = vld [vmem:[#allocation2 + $0x134] sm:$0xf]  ;;  %v2707_v43 = vld [vmem:[#allocation2 + $0x138] sm:$0xf0] }
 0x179   : > { %1787 = vmatpush.bf16.msra.mxu1 %v2782_v36 }
 0x17a   : > { %v1171_v50 = vmax.f32 %v967_v46, 0.0  ;;  %v1124_v63 = vadd.f32 %v1123_v48, %v1095_v56  ;;  %v2710_v46 = vor.u32 %v2948_v44, %v2707_v43  ;;  %v2964_v56 = vld [vmem:[#allocation2 + $0x1b4] sm:$0xf] }
 0x17c   : > { %v3790_v51 = vpack.c.bf16 %v1171_v50, %v1167_v49  ;;  %v1146_v8 = vmax.f32 %v1124_v63, 0.0  ;;  %1759 = vmatpush.bf16.msra.mxu0 %v2710_v46 }
 0x17d   : > { %v1036_v59 = vpop.f32.mrf.mxu2 }
 0x17e   : > { %v1065_v14 = vpop.f32.mrf.mxu3  ;;  %1604 = vmatmul.bf16.gmra.mxu2 %v3790_v51  ;;  %v1037_v54 = vadd.f32 %v1036_v59, %v3793_v61  ;;  %v2774_v59 = vor.u32 %v2964_v56, %v2771_v58 }
 0x17f   : > { %v1096_v62 = vpop.f32.mrf.mxu0 }
 0x180   : > { %v1097_v0 = vadd.f32 %v1096_v62, %v3786_v47  ;;  %v1125_v1 = vpop.f32.mrf.mxu1  ;;  %v1066_v40 = vadd.f32 %v1065_v14, %v1037_v54  ;;  %1788 = vmatpush.bf16.msra.mxu1 %v2774_v59 }
 0x182   : > { %v1126_v3 = vadd.f32 %v1125_v1, %v1097_v0  ;;  %v1145_v25 = vmax.f32 %v1066_v40, 0.0  ;;  %v2962_v0 = vld [vmem:[#allocation2 + $0x1a4] sm:$0xf]  ;;  %v2763_v1 = vld [vmem:[#allocation2 + $0x1a8] sm:$0xf0] }
 0x183   : > { %v2766_v7 = vor.u32 %v2962_v0, %v2763_v1  ;;  %v2691_v40 = vld [vmem:[#allocation2 + $0x118] sm:$0xf0] }
 0x184   : > { %v1150_v9 = vmax.f32 %v1126_v3, 0.0 }
 0x185   : > { %v1038_v10 = vpop.f32.mrf.mxu2  ;;  %1789 = vmatpush.bf16.msra.mxu1 %v2766_v7 }
 0x186   : > { %v3798_v11 = vpack.c.bf16 %v1150_v9, %v1146_v8  ;;  %v1039_v12 = vadd.f32 %v1038_v10, %v3793_v61  ;;  %v1067_v15 = vpop.f32.mrf.mxu3  ;;  %v2702_v9 = vor.u32 %v2946_v4, %v2699_v6  ;;  %v3835_v6 = vld [vmem:[%s4139_s6] sm:$0x3] }
 0x187   : > { %v1099_v18 = vpop.f32.mrf.mxu0 }
 0x188   : > { %v1068_v21 = vadd.f32 %v1067_v15, %v1039_v12  ;;  %v1128_v22 = vpop.f32.mrf.mxu1  ;;  %1676 = vmatmul.bf16.vlgmr.msrb.gmra.mxu1 %v3798_v11  ;;  %1734 = vmatmul.bf16.vlgmr.msra.gmra.mxu3 %v3752_v5  ;;  %v1100_v28 = vadd.f32 %v1099_v18, %v3786_v47  ;;  %v2960_v12 = vld [vmem:[#allocation2 + $0x194] sm:$0xf]  ;;  %v2958_v18 = vld [vmem:[#allocation2 + $0x184] sm:$0xf] }
 0x189   : > { %1760 = vmatpush.bf16.msra.mxu0 %v2702_v9 }
 0x18a   : > { %v1149_v26 = vmax.f32 %v1068_v21, 0.0  ;;  %v1129_v37 = vadd.f32 %v1128_v22, %v1100_v28  ;;  %v2942_v28 = vld [vmem:[#allocation2 + $0x104] sm:$0xf] }
 0x18b   : > { %v2686_v32 = vor.u32 %v2942_v28, %v2683_v29 }
 0x18c   : > { %v3803_v27 = vpack.c.bf16 %v1149_v26, %v1145_v25  ;;  %v1154_v48 = vmax.f32 %v1129_v37, 0.0  ;;  %v2758_v25 = vor.u32 %v2960_v12, %v2755_v17  ;;  %v2747_v26 = vld [vmem:[#allocation2 + $0x188] sm:$0xf0] }
 0x18d   : > { %v1041_v31 = vpop.f32.mrf.mxu2 }
 0x18e   : > { %v1070_v35 = vpop.f32.mrf.mxu3  ;;  %1647 = vmatmul.bf16.vlgmr.msrb.gmra.mxu0 %v3803_v27  ;;  %1705 = vmatmul.bf16.vlgmr.msra.gmra.mxu2 %v3756_v23  ;;  %v1042_v41 = vadd.f32 %v1041_v31, %v3793_v61  ;;  %v2750_v31 = vor.u32 %v2958_v18, %v2747_v26 }
 0x18f   : > { %v1101_v5 = vpop.f32.mrf.mxu0  ;;  %1790 = vmatpush.bf16.msra.mxu1 %v2758_v25 }
 0x190   : > { %v1102_v38 = vadd.f32 %v1101_v5, %v3786_v47  ;;  %v1130_v39 = vpop.f32.mrf.mxu1  ;;  %v1071_v53 = vadd.f32 %v1070_v35, %v1042_v41 }
 0x192   : > { %v1131_v42 = vadd.f32 %v1130_v39, %v1102_v38  ;;  %v1153_v62 = vmax.f32 %v1071_v53, 0.0 }
 0x193   : > { %1791 = vmatpush.bf16.msra.mxu1 %v2750_v31 }
 0x194   : > { %v1158_v49 = vmax.f32 %v1131_v42, 0.0 }
 0x195   : > { %v1043_v50 = vpop.f32.mrf.mxu2 }
 0x196   : > { %v1044_v23 = vadd.f32 %v1043_v50, %v3793_v61  ;;  %v1072_v57 = vpop.f32.mrf.mxu3  ;;  %v3811_v52 = vpack.c.bf16 %v1158_v49, %v1154_v48 }
 0x197   : > { %v1104_v13 = vpop.f32.mrf.mxu0 }
 0x198   : > { %v1073_v60 = vadd.f32 %v1072_v57, %v1044_v23  ;;  %v1133_v14 = vpop.f32.mrf.mxu1  ;;  %1681 = vmatmul.bf16.gmra.mxu1 %v3811_v52  ;;  %1739 = vmatmul.bf16.gmra.mxu3 %v3763_v2  ;;  %v1105_v54 = vadd.f32 %v1104_v13, %v3786_v47  ;;  %v2944_v2 = vld [vmem:[#allocation2 + $0x114] sm:$0xf] }
 0x199   : > { %v2694_v16 = vor.u32 %v2944_v2, %v2691_v40 }
 0x19a   : > { %v1157_v63 = vmax.f32 %v1073_v60, 0.0  ;;  %v1134_v19 = vadd.f32 %v1133_v14, %v1105_v54 }
 0x19b   : > { %1761 = vmatpush.bf16.msra.mxu0 %v2694_v16 }
 0x19c   : > { %v3816_v3 = vpack.c.bf16 %v1157_v63, %v1153_v62  ;;  %v1162_v33 = vmax.f32 %v1134_v19, 0.0 }
 0x19d   : > { %v1046_v8 = vpop.f32.mrf.mxu2 }
 0x19e   : > { %v1075_v10 = vpop.f32.mrf.mxu3  ;;  %1652 = vmatmul.bf16.gmra.mxu0 %v3816_v3  ;;  %1710 = vmatmul.bf16.gmra.mxu2 %v3767_v24  ;;  %v1047_v30 = vadd.f32 %v1046_v8, %v3793_v61 }
 0x19f   : > { %v1106_v15 = vpop.f32.mrf.mxu0  ;;  %1762 = vmatpush.bf16.msra.mxu0 %v2686_v32 }
 0x1a0   : > { %v1107_v21 = vadd.f32 %v1106_v15, %v3786_v47  ;;  %v1135_v22 = vpop.f32.mrf.mxu1  ;;  %v1076_v36 = vadd.f32 %v1075_v10, %v1047_v30 }
 0x1a2   : > { %v1136_v24 = vadd.f32 %v1135_v22, %v1107_v21  ;;  %v1161_v44 = vmax.f32 %v1076_v36, 0.0 }
 0x1a4   : > { %v1166_v34 = vmax.f32 %v1136_v24, 0.0 }
 0x1a5   : > { %v1048_v35 = vpop.f32.mrf.mxu2 }
 0x1a6   : > { %v1186_v5 = vpack.c.bf16 %v1166_v34, %v1162_v33  ;;  %v1049_v37 = vadd.f32 %v1048_v35, %v3793_v61  ;;  %v1077_v38 = vpop.f32.mrf.mxu3 }
 0x1a7   : > { %v1109_v39 = vpop.f32.mrf.mxu0 }
 0x1a8   : > { %v1078_v41 = vadd.f32 %v1077_v38, %v1049_v37  ;;  %v1138_v42 = vpop.f32.mrf.mxu1  ;;  %1686 = vmatmul.bf16.gmra.mxu1 %v1186_v5  ;;  %1744 = vmatmul.bf16.gmra.mxu3 %v3773_v55  ;;  %v1110_v48 = vadd.f32 %v1109_v39, %v3786_v47 }
 0x1aa   : > { %v1165_v43 = vmax.f32 %v1078_v41, 0.0  ;;  %v1139_v23 = vadd.f32 %v1138_v42, %v1110_v48 }
 0x1ac   : > { %v1185_v46 = vpack.c.bf16 %v1165_v43, %v1161_v44  ;;  %v1170_v59 = vmax.f32 %v1139_v23, 0.0 }
 0x1ad   : > { %v1051_v49 = vpop.f32.mrf.mxu2 }
 0x1ae   : > { %v1080_v50 = vpop.f32.mrf.mxu3  ;;  %1657 = vmatmul.bf16.gmra.mxu0 %v1185_v46  ;;  %1715 = vmatmul.bf16.gmra.mxu2 %v3777_v20  ;;  %v1052_v58 = vadd.f32 %v1051_v49, %v3793_v61 }
 0x1af   : > { %v1111_v53 = vpop.f32.mrf.mxu0 }
 0x1b0   : > { %v1112_v57 = vadd.f32 %v1111_v53, %v3786_v47  ;;  %v1140_v56 = vpop.f32.mrf.mxu1  ;;  %v1081_v14 = vadd.f32 %v1080_v50, %v1052_v58 }
 0x1b2   : > { %v1141_v13 = vadd.f32 %v1140_v56, %v1112_v57  ;;  %v1169_v20 = vmax.f32 %v1081_v14, 0.0 }
 0x1b4   : > { %v1174_v55 = vmax.f32 %v1141_v13, 0.0 }
 0x1b5   : > { %v1053_v60 = vpop.f32.mrf.mxu2 }
 0x1b6   : > { %v1190_v62 = vpack.c.bf16 %v1174_v55, %v1170_v59  ;;  %v1054_v63 = vadd.f32 %v1053_v60, %v3793_v61  ;;  %v1082_v0 = vpop.f32.mrf.mxu3  ;;  %v1257_v61 = vperm.slane %v3835_v6, 0 }
 0x1b8   : > { %v1083_v1 = vadd.f32 %v1082_v0, %v1054_v63  ;;  %1691 = vmatmul.bf16.gmra.mxu1 %v1190_v62  ;;  %1749 = vmatmul.bf16.gmra.mxu3 %v3783_v45 }
 0x1ba   : > { %v1173_v54 = vmax.f32 %v1083_v1, 0.0 }
 0x1bc   : > { %v1189_v4 = vpack.c.bf16 %v1173_v54, %v1169_v20 }
 0x1be   : > { %1662 = vmatmul.bf16.gmra.mxu0 %v1189_v4  ;;  %1720 = vmatmul.bf16.gmra.mxu2 %v3790_v51 }
 0x1c8   : > { %1792 = vmatmul.bf16.vlgmr.msra.gmra.mxu1 %v3798_v11 }
 0x1cb   : > { %v1619_v47 = vpop.f32.mrf.mxu3 }
 0x1ce   : > { %1763 = vmatmul.bf16.vlgmr.msra.gmra.mxu0 %v3803_v27 }
 0x1d1   : > { %v1590_v7 = vpop.f32.mrf.mxu2 }
 0x1d2   : > { %v1591_v45 = vadd.f32 %v1590_v7, %v1257_v61 }
 0x1d3   : > { %v1621_v8 = vpop.f32.mrf.mxu3 }
 0x1d4   : > { %v1620_v9 = vadd.f32 %v1619_v47, %v1591_v45 }
 0x1d8   : > { %1797 = vmatmul.bf16.gmra.mxu1 %v3811_v52 }
 0x1d9   : > { %v1592_v10 = vpop.f32.mrf.mxu2 }
 0x1da   : > { %v1593_v51 = vadd.f32 %v1592_v10, %v1257_v61 }
 0x1db   : > { %v1624_v2 = vpop.f32.mrf.mxu3 }
 0x1dc   : > { %v1622_v11 = vadd.f32 %v1621_v8, %v1593_v51 }
 0x1de   : > { %1768 = vmatmul.bf16.gmra.mxu0 %v3816_v3 }
 0x1e1   : > { %v1595_v40 = vpop.f32.mrf.mxu2 }
 0x1e2   : > { %v1596_v12 = vadd.f32 %v1595_v40, %v1257_v61 }
 0x1e3   : > { %v1626_v15 = vpop.f32.mrf.mxu3 }
 0x1e4   : > { %v1625_v16 = vadd.f32 %v1624_v2, %v1596_v12 }
 0x1e8   : > { %1802 = vmatmul.bf16.gmra.mxu1 %v1186_v5 }
 0x1e9   : > { %v1597_v27 = vpop.f32.mrf.mxu2 }
 0x1ea   : > { %v1598_v17 = vadd.f32 %v1597_v27, %v1257_v61 }
 0x1eb   : > { %v1629_v19 = vpop.f32.mrf.mxu3 }
 0x1ec   : > { %v1627_v18 = vadd.f32 %v1626_v15, %v1598_v17 }
 0x1ee   : > { %1773 = vmatmul.bf16.gmra.mxu0 %v1185_v46 }
 0x1f1   : > { %v1600_v21 = vpop.f32.mrf.mxu2 }
 0x1f2   : > { %v1601_v22 = vadd.f32 %v1600_v21, %v1257_v61 }
 0x1f3   : > { %v1631_v52 = vpop.f32.mrf.mxu3 }
 0x1f4   : > { %v1630_v25 = vadd.f32 %v1629_v19, %v1601_v22 }
 0x1f8   : > { %1807 = vmatmul.bf16.gmra.mxu1 %v1190_v62 }
 0x1f9   : > { %v1602_v26 = vpop.f32.mrf.mxu2 }
 0x1fa   : > { %v1603_v28 = vadd.f32 %v1602_v26, %v1257_v61 }
 0x1fb   : > { %v1634_v3 = vpop.f32.mrf.mxu3 }
 0x1fc   : > { %v1632_v29 = vadd.f32 %v1631_v52, %v1603_v28 }
 0x1fe   : > { %1778 = vmatmul.bf16.gmra.mxu0 %v1189_v4 }
 0x201   : > { %v1605_v30 = vpop.f32.mrf.mxu2 }
 0x202   : > { %v1606_v24 = vadd.f32 %v1605_v30, %v1257_v61 }
 0x203   : > { %v1636_v35 = vpop.f32.mrf.mxu3 }
 0x204   : > { %v1635_v31 = vadd.f32 %v1634_v3, %v1606_v24 }
 0x205   : > { %v1677_v32 = vpop.f32.mrf.mxu1 }
 0x209   : > { %v1607_v33 = vpop.f32.mrf.mxu2 }
 0x20a   : > { %v1608_v34 = vadd.f32 %v1607_v33, %v1257_v61 }
 0x20b   : > { %v1648_v36 = vpop.f32.mrf.mxu0  ;;  %v1735_v20 = vpop.f32.mrf.mxu3 }
 0x20c   : > { %v1649_v5 = vadd.f32 %v1648_v36, %v1620_v9  ;;  %v1637_v37 = vadd.f32 %v1636_v35, %v1608_v34  ;;  %v3846_v9 = vperm.slane %v3835_v6, 1 }
 0x20d   : > { %v1679_v38 = vpop.f32.mrf.mxu1 }
 0x20e   : > { %v1678_v39 = vadd.f32 %v1677_v32, %v1649_v5 }
 0x210   : > { %v2807_v1 = vmul.f32 -1.442695, %v1678_v39 }
 0x211   : > { %v1706_v14 = vpop.f32.mrf.mxu2 }
 0x212   : > { %3011 = vpow2.f32 %v2807_v1  ;;  %v1707_v12 = vadd.f32 %v1706_v14, %v3846_v9 }
 0x213   : > { %v1650_v41 = vpop.f32.mrf.mxu0  ;;  %v1737_v51 = vpop.f32.mrf.mxu3 }
 0x214   : > { %v1651_v42 = vadd.f32 %v1650_v41, %v1622_v11 }
 0x215   : > { %v1682_v44 = vpop.f32.mrf.mxu1 }
 0x216   : > { %v1680_v43 = vadd.f32 %v1679_v38, %v1651_v42 }
 0x218   : > { %v2809_v47 = vmul.f32 -1.442695, %v1680_v43  ;;  %v3012_v8 = vpop.eup %3011 }
 0x219   : > { %v1708_v7 = vpop.f32.mrf.mxu2  ;;  %v3848_v11 = vadd.f32 1.0, %v3012_v8 }
 0x21a   : > { %3013 = vpow2.f32 %v2809_v47 }
 0x21b   : > { %v1653_v46 = vpop.f32.mrf.mxu0  ;;  %3015 = vrcp.f32 %v3848_v11  ;;  %v1740_v52 = vpop.f32.mrf.mxu3  ;;  %vm1882_vm1 = vweird.f32 %v3848_v11 }
 0x21c   : > { %v1654_v48 = vadd.f32 %v1653_v46, %v1625_v16 }
 0x21d   : > { %v1684_v49 = vpop.f32.mrf.mxu1 }
 0x21e   : > { %v1683_v50 = vadd.f32 %v1682_v44, %v1654_v48 }
 0x220   : > { %v3014_v16 = vpop.eup %3013  ;;  %v2811_v21 = vmul.f32 -1.442695, %v1683_v50 }
 0x221   : > { %v1711_v27 = vpop.f32.mrf.mxu2  ;;  %v3854_v17 = vadd.f32 1.0, %v3014_v16  ;;  %v3858_v28 = vpop.eup %3015 }
 0x222   : > { %v1878_v30 = vmul.f32 %v3858_v28, %v3848_v11  ;;  %v1712_v5 = vadd.f32 %v1711_v27, %v3846_v9  ;;  %vm1883_vm0 = vweird.f32 %v3858_v28 }
 0x223   : > { %v1655_v53 = vpop.f32.mrf.mxu0  ;;  %3017 = vrcp.f32 %v3854_v17  ;;  %v1742_v42 = vpop.f32.mrf.mxu3  ;;  %v1918_v47 = vand.u32 2147483648, %v3854_v17  ;;  %vm3891_vm3 = vmor %vm1882_vm1, %vm1883_vm0  ;;  %vm1912_vm4 = vweird.f32 %v3854_v17 }
 0x224   : > { %v1656_v23 = vadd.f32 %v1655_v53, %v1627_v18  ;;  %v1736_v18 = vadd.f32 %v1735_v20, %v1707_v12  ;;  %3019 = vpow2.f32 %v2811_v21  ;;  %v1879_v36 = vsub.f32 1.0, %v1878_v30 }
 0x225   : > { %v1687_v57 = vpop.f32.mrf.mxu1  ;;  %v1741_v53 = vadd.f32 %v1740_v52, %v1712_v5 }
 0x226   : > { %v1685_v56 = vadd.f32 %v1684_v49, %v1656_v23  ;;  %v1880_v49 = vmul.f32 %v3858_v28, %v1879_v36 }
 0x228   : > { %v1881_v14 = vadd.f32 %v3858_v28, %v1880_v49 }
 0x229   : > { %v1713_v24 = vpop.f32.mrf.mxu2  ;;  %v3862_v33 = vpop.eup %3017 }
 0x22a   : > { %v3020_v38 = vpop.eup %3019  ;;  %v1908_v39 = vmul.f32 %v3862_v33, %v3854_v17  ;;  %vm1913_vm5 = vweird.f32 %v3862_v33 }
 0x22b   : > { %v1658_v58 = vpop.f32.mrf.mxu0  ;;  %v3870_v50 = vadd.f32 1.0, %v3020_v38  ;;  %vm3922_vm7 = vmor %vm1912_vm4, %vm1913_vm5 }
 0x22c   : > { %v1659_v13 = vadd.f32 %v1658_v58, %v1630_v25  ;;  %v1709_v25 = vadd.f32 %v1708_v7, %v3846_v9  ;;  %v1909_v23 = vsub.f32 1.0, %v1908_v39 }
 0x22d   : > { %v1689_v59 = vpop.f32.mrf.mxu1  ;;  %vm1942_vm12 = vweird.f32 %v3870_v50 }
 0x22e   : > { %v1688_v55 = vadd.f32 %v1687_v57, %v1659_v13  ;;  %v1910_v1 = vmul.f32 %v3862_v33, %v1909_v23 }
 0x230   : > { %v2815_v44 = vmul.f32 -1.442695, %v1688_v55  ;;  %v1911_v27 = vadd.f32 %v3862_v33, %v1910_v1 }
 0x231   : > { %v1716_v58 = vpop.f32.mrf.mxu2 }
 0x232   : > { %v1915_v36 = vsel %vm3922_vm7, %v3862_v33, %v1911_v27 }
 0x233   : > { %v1660_v60 = vpop.f32.mrf.mxu0 }
 0x234   : > { %v1661_v62 = vadd.f32 %v1660_v60, %v1632_v29  ;;  %v2813_v29 = vmul.f32 -1.442695, %v1685_v56  ;;  %v1886_v56 = vand.u32 2147483647, %v3848_v11 }
 0x235   : > { %v1692_v63 = vpop.f32.mrf.mxu1 }
 0x236   : > { %v3841_v0 = vadd.f32 %v1689_v59, %v1661_v62  ;;  %v1888_v59 = vand.u32 2147483648, %v3848_v11  ;;  %v1714_v62 = vadd.f32 %v1713_v24, %v3846_v9  ;;  %vm3883_vm2 = vcmp.eq.f32.partialorder %v1886_v56, 8.507059e+37 }
 0x237   : > { %v1885_v11 = vsel %vm3891_vm3, %v3858_v28, %v1881_v14 }
 0x238   : > { %v1743_v16 = vadd.f32 %v1742_v42, %v1714_v62 }
 0x23b   : > { %v1663_v54 = vpop.f32.mrf.mxu0 }
 0x23c   : > { %v1664_v4 = vadd.f32 %v1663_v54, %v1635_v31  ;;  %v1738_v31 = vadd.f32 %v1737_v51, %v1709_v25  ;;  %v2817_v25 = vmul.f32 -1.442695, %v3841_v0 }
 0x23d   : > { %v1694_v61 = vpop.f32.mrf.mxu1 }
 0x23e   : > { %v3843_v45 = vadd.f32 %v1692_v63, %v1664_v4  ;;  %v1916_v4 = vand.u32 2147483647, %v3854_v17  ;;  %v1946_v17 = vand.u32 2147483647, %v3870_v50 }
 0x240   : > { %vm3909_vm6 = vcmp.eq.f32.partialorder %v1916_v4, 8.507059e+37  ;;  %vm3972_vm1 = vcmp.eq.f32.partialorder %v1946_v17, 8.507059e+37 }
 0x243   : > { %v1665_v10 = vpop.f32.mrf.mxu0 }
 0x244   : > { %v1666_v2 = vadd.f32 %v1665_v10, %v1637_v37  ;;  %v1889_v10 = vor.u32 1.1754944e-38, %v1888_v59 }
 0x245   : > { %v1793_v40 = vpop.f32.mrf.mxu1 }
 0x246   : > { %v3851_v15 = vadd.f32 %v1694_v61, %v1666_v2  ;;  %v1890_v28 = vsel %vm3883_vm2, %v1889_v10, %v1885_v11 }
 0x24b   : > { %v1764_v19 = vpop.f32.mrf.mxu0 }
 0x24c   : > { %v1765_v6 = vadd.f32 %v1764_v19, %v1736_v18  ;;  %v1948_v18 = vand.u32 2147483648, %v3870_v50 }
 0x24d   : > { %v1795_v22 = vpop.f32.mrf.mxu1 }
 0x24e   : > { %v1794_v26 = vadd.f32 %v1793_v40, %v1765_v6  ;;  %v1745_v40 = vpop.f32.mrf.mxu3 }
 0x250   : > { %v2808_v3 = vmul.f32 -1.442695, %v1794_v26 }
 0x252   : > { %3021 = vpow2.f32 %v2808_v3  ;;  %v1717_v3 = vadd.f32 %v1716_v58, %v3846_v9 }
 0x253   : > { %v1766_v32 = vpop.f32.mrf.mxu0  ;;  %3023 = vpow2.f32 %v2813_v29 }
 0x254   : > { %v1767_v34 = vadd.f32 %v1766_v32, %v1738_v31  ;;  %v1718_v31 = vpop.f32.mrf.mxu2 }
 0x255   : > { %v1798_v35 = vpop.f32.mrf.mxu1 }
 0x256   : > { %v1796_v37 = vadd.f32 %v1795_v22, %v1767_v34  ;;  %v1919_v22 = vor.u32 1.1754944e-38, %v1918_v47  ;;  %v1747_v58 = vpop.f32.mrf.mxu3 }
 0x258   : > { %v3022_v41 = vpop.eup %3021  ;;  %v2810_v43 = vmul.f32 -1.442695, %v1796_v37  ;;  %v3935_v37 = vor.u32 1.1754944e-38, %v1948_v18  ;;  %v1920_v62 = vsel %vm3909_vm6, %v1919_v22, %v1915_v36  ;;  %v2821_v36 = vmul.f32 -1.442695, %v3851_v15 }
 0x259   : > { %v3867_v46 = vadd.f32 1.0, %v3022_v41  ;;  %v3024_v48 = vpop.eup %3023 }
 0x25a   : > { %3025 = vpow2.f32 %v2810_v43  ;;  %v3876_v55 = vadd.f32 1.0, %v3024_v48  ;;  %v1746_v48 = vadd.f32 %v1745_v40, %v1717_v3 }
 0x25b   : > { %3027 = vrcp.f32 %v3867_v46  ;;  %v1769_v57 = vpop.f32.mrf.mxu0  ;;  %v1903_v30 = vand.u32 2147483648, %v3867_v46  ;;  %v1901_v32 = vand.u32 2147483647, %v3867_v46  ;;  %vm1897_vm9 = vweird.f32 %v3867_v46 }
 0x25c   : > { %3029 = vpow2.f32 %v2815_v44  ;;  %v1770_v13 = vadd.f32 %v1769_v57, %v1741_v53  ;;  %v1976_v10 = vand.u32 2147483647, %v3876_v55  ;;  %vm1972_vm3 = vweird.f32 %v3876_v55 }
 0x25d   : > { %v1800_v60 = vpop.f32.mrf.mxu1  ;;  %3031 = vrcp.f32 %v3870_v50  ;;  %v1904_v33 = vor.u32 1.1754944e-38, %v1903_v30  ;;  %vm1902_vm11 = vcmp.eq.f32.partialorder %v1901_v32, 8.507059e+37 }
 0x25e   : > { %v1799_v63 = vadd.f32 %v1798_v35, %v1770_v13  ;;  %3033 = vrcp.f32 %v3876_v55  ;;  %v1719_v13 = vadd.f32 %v1718_v31, %v3846_v9  ;;  %vm4002_vm7 = vcmp.eq.f32.partialorder %v1976_v10, 8.507059e+37 }
 0x260   : > { %v3026_v20 = vpop.eup %3025  ;;  %v2812_v61 = vmul.f32 -1.442695, %v1799_v63  ;;  %v2819_v63 = vmul.f32 -1.442695, %v3843_v45  ;;  %v1721_v45 = vpop.f32.mrf.mxu2 }
 0x261   : > { %v3028_v7 = vpop.eup %3027  ;;  %v3897_v51 = vadd.f32 1.0, %v3026_v20 }
 0x262   : > { %v3030_v2 = vpop.eup %3029  ;;  %v1893_v12 = vmul.f32 %v3028_v7, %v3867_v46  ;;  %3035 = vpow2.f32 %v2812_v61  ;;  %vm1898_vm8 = vweird.f32 %v3028_v7 }
 0x263   : > { %3037 = vrcp.f32 %v3897_v51  ;;  %v1771_v19 = vpop.f32.mrf.mxu0  ;;  %v3907_v6 = vpop.eup %3031  ;;  %v3916_v29 = vadd.f32 1.0, %v3030_v2  ;;  %vm1899_vm10 = vmor %vm1897_vm9, %vm1898_vm8  ;;  %v1933_v1 = vand.u32 2147483648, %v3897_v51  ;;  %v1931_v4 = vand.u32 2147483647, %v3897_v51 }
 0x264   : > { %v1894_v52 = vsub.f32 1.0, %v1893_v12  ;;  %v1772_v26 = vadd.f32 %v1771_v19, %v1743_v16  ;;  %v3927_v35 = vpop.eup %3033  ;;  %v1938_v5 = vmul.f32 %v3907_v6, %v3870_v50  ;;  %3039 = vpow2.f32 %v2817_v25 }
 0x265   : > { %v1803_v38 = vpop.f32.mrf.mxu1  ;;  %3041 = vrcp.f32 %v3916_v29  ;;  %v1968_v23 = vmul.f32 %v3927_v35, %v3876_v55  ;;  %vm1943_vm13 = vweird.f32 %v3907_v6  ;;  %v1978_v2 = vand.u32 2147483648, %v3876_v55 }
 0x266   : > { %v1895_v0 = vmul.f32 %v3028_v7, %v1894_v52  ;;  %v1801_v34 = vadd.f32 %v1800_v60, %v1772_v26  ;;  %v1939_v46 = vsub.f32 1.0, %v1938_v5  ;;  %vm1927_vm15 = vweird.f32 %v3897_v51  ;;  %vm3991_vm4 = vmor %vm1942_vm12, %vm1943_vm13 }
 0x267   : > { %v1969_v8 = vsub.f32 1.0, %v1968_v23  ;;  %v1748_v16 = vadd.f32 %v1747_v58, %v1719_v13  ;;  %v1934_v19 = vor.u32 1.1754944e-38, %v1933_v1  ;;  %vm1932_vm2 = vcmp.eq.f32.partialorder %v1931_v4, 8.507059e+37 }
 0x268   : > { %v3036_v39 = vpop.eup %3035  ;;  %v1896_v41 = vadd.f32 %v3028_v7, %v1895_v0  ;;  %v2814_v42 = vmul.f32 -1.442695, %v1801_v34  ;;  %v1722_v34 = vadd.f32 %v1721_v45, %v3846_v9  ;;  %vm1973_vm6 = vweird.f32 %v3927_v35  ;;  %v1723_v58 = vpop.f32.mrf.mxu2 }
 0x269   : > { %v3038_v44 = vpop.eup %3037  ;;  %v3941_v43 = vadd.f32 1.0, %v3036_v39  ;;  %v1724_v10 = vadd.f32 %v1723_v58, %v3846_v9  ;;  %v2008_v17 = vand.u32 2147483648, %v3916_v29 }
 0x26a   : > { %v1900_v49 = vsel %vm1899_vm10, %v3028_v7, %v1896_v41  ;;  %v1923_v53 = vmul.f32 %v3038_v44, %v3897_v51  ;;  %3043 = vpow2.f32 %v2814_v42  ;;  %v3040_v20 = vpop.eup %3039  ;;  %vm1928_vm14 = vweird.f32 %v3038_v44 }
 0x26b   : > { %v1905_v57 = vsel %vm1902_vm11, %v1904_v33, %v1900_v49  ;;  %3045 = vrcp.f32 %v3941_v43  ;;  %v1774_v56 = vpop.f32.mrf.mxu0  ;;  %v3961_v61 = vpop.eup %3041  ;;  %v1940_v7 = vmul.f32 %v3907_v6, %v1939_v46  ;;  %v3967_v18 = vadd.f32 1.0, %v3040_v20  ;;  %vm1929_vm0 = vmor %vm1927_vm15, %vm1928_vm14 }
 0x26c   : > { %v2117_v59 = vpack.c.bf16 %v1905_v57, %v1890_v28  ;;  %v1924_v60 = vsub.f32 1.0, %v1923_v53  ;;  %v1775_v14 = vadd.f32 %v1774_v56, %v1746_v48  ;;  %3047 = vpow2.f32 %v2819_v63  ;;  %vm4023_vm11 = vmor %vm1972_vm3, %vm1973_vm6 }
 0x26d   : > { %v1805_v22 = vpop.f32.mrf.mxu1  ;;  %v1941_v26 = vadd.f32 %v3907_v6, %v1940_v7  ;;  %v1970_v28 = vmul.f32 %v3927_v35, %v1969_v8  ;;  %v1998_v24 = vmul.f32 %v3961_v61, %v3916_v29  ;;  %v1963_v5 = vand.u32 2147483648, %v3941_v43 }
 0x26e   : > { %2125 = vst [vmem:[%s3947_s28] sm:$0xff] %v2117_v59  ;;  %v1925_v54 = vmul.f32 %v3038_v44, %v1924_v60  ;;  %v1804_v47 = vadd.f32 %v1803_v38, %v1775_v14  ;;  %v1750_v38 = vpop.f32.mrf.mxu3  ;;  %v1961_v41 = vand.u32 2147483647, %v3941_v43  ;;  %vm1957_vm8 = vweird.f32 %v3941_v43 }
 0x26f   : > { %v1945_v15 = vsel %vm3991_vm4, %v3907_v6, %v1941_v26  ;;  %v1971_v33 = vadd.f32 %v3927_v35, %v1970_v28  ;;  %v1999_v49 = vsub.f32 1.0, %v1998_v24  ;;  %v1964_v57 = vor.u32 1.1754944e-38, %v1963_v5 }
 0x270   : > { %v3044_v11 = vpop.eup %3043  ;;  %v1926_v40 = vadd.f32 %v3038_v44, %v1925_v54  ;;  %v2816_v12 = vmul.f32 -1.442695, %v1804_v47  ;;  %v1751_v56 = vadd.f32 %v1750_v38, %v1722_v34  ;;  %vm1962_vm10 = vcmp.eq.f32.partialorder %v1961_v41, 8.507059e+37 }
 0x271   : > { %v3046_v27 = vpop.eup %3045  ;;  %v3970_v21 = vadd.f32 1.0, %v3044_v11  ;;  %v1979_v54 = vor.u32 1.1754944e-38, %v1978_v2  ;;  %v1975_v7 = vsel %vm4023_vm11, %v3927_v35, %v1971_v33  ;;  %v2000_v8 = vmul.f32 %v3961_v61, %v1999_v49 }
 0x272   : > { %v1930_v52 = vsel %vm1929_vm0, %v3038_v44, %v1926_v40  ;;  %v1953_v51 = vmul.f32 %v3046_v27, %v3941_v43  ;;  %3049 = vpow2.f32 %v2816_v12  ;;  %vm1958_vm5 = vweird.f32 %v3046_v27  ;;  %v3048_v44 = vpop.eup %3047 }
 0x273   : > { %v1935_v3 = vsel %vm1932_vm2, %v1934_v19, %v1930_v52  ;;  %3051 = vrcp.f32 %v3970_v21  ;;  %v1776_v30 = vpop.f32.mrf.mxu0  ;;  %vm1959_vm9 = vmor %vm1957_vm8, %vm1958_vm5  ;;  %v1950_v43 = vsel %vm3972_vm1, %v3935_v37, %v1945_v15  ;;  %v4016_v14 = vadd.f32 1.0, %v3048_v44 }
 0x274   : > { %v2118_v31 = vpack.c.bf16 %v1935_v3, %v1920_v62  ;;  %v1954_v0 = vsub.f32 1.0, %v1953_v51  ;;  %v1777_v32 = vadd.f32 %v1776_v30, %v1748_v16  ;;  %3053 = vrcp.f32 %v3967_v18 }
 0x275   : > { %3055 = vpow2.f32 %v2821_v36  ;;  %v1808_v63 = vpop.f32.mrf.mxu1  ;;  %v1993_v11 = vand.u32 2147483648, %v3970_v21  ;;  %v1991_v40 = vand.u32 2147483647, %v3970_v21  ;;  %vm2003_vm13 = vweird.f32 %v3961_v61 }
 0x276   : > { %2126 = vst [vmem:[%s3947_s28 + $0x8] sm:$0xff] %v2118_v31  ;;  %v1955_v39 = vmul.f32 %v3046_v27, %v1954_v0  ;;  %v1806_v42 = vadd.f32 %v1805_v22, %v1777_v32  ;;  %v2006_v12 = vand.u32 2147483647, %v3916_v29  ;;  %v1980_v9 = vsel %vm4002_vm7, %v1979_v54, %v1975_v7 }
 0x277   : > { %vm1987_vm14 = vweird.f32 %v3970_v21  ;;  %v2001_v52 = vadd.f32 %v3961_v61, %v2000_v8  ;;  %v1994_v51 = vor.u32 1.1754944e-38, %v1993_v11  ;;  %vm1992_vm0 = vcmp.eq.f32.partialorder %v1991_v40, 8.507059e+37 }
 0x278   : > { %v3050_v48 = vpop.eup %3049  ;;  %v1956_v53 = vadd.f32 %v3046_v27, %v1955_v39  ;;  %v2818_v46 = vmul.f32 -1.442695, %v1806_v42  ;;  %vm2002_vm1 = vweird.f32 %v3916_v29  ;;  %vm4069_vm4 = vcmp.eq.f32.partialorder %v2006_v12, 8.507059e+37 }
 0x279   : > { %v3052_v23 = vpop.eup %3051  ;;  %v4008_v6 = vadd.f32 1.0, %v3050_v48  ;;  %vm4060_vm2 = vmor %vm2002_vm1, %vm2003_vm13  ;;  %v2038_v54 = vand.u32 2147483648, %v3967_v18  ;;  %vm2062_vm1 = vweird.f32 %v4016_v14 }
 0x27a   : > { %v1960_v13 = vsel %vm1959_vm9, %v3046_v27, %v1956_v53  ;;  %v1983_v59 = vmul.f32 %v3052_v23, %v3970_v21  ;;  %3057 = vpow2.f32 %v2818_v46  ;;  %v4011_v60 = vpop.eup %3053  ;;  %vm1988_vm12 = vweird.f32 %v3052_v23  ;;  %v1752_v27 = vpop.f32.mrf.mxu3 }
 0x27b   : > { %v1965_v62 = vsel %vm1962_vm10, %v1964_v57, %v1960_v13  ;;  %3059 = vrcp.f32 %v4008_v6  ;;  %v1779_v1 = vpop.f32.mrf.mxu0  ;;  %v3056_v2 = vpop.eup %3055  ;;  %v2028_v35 = vmul.f32 %v4011_v60, %v3967_v18  ;;  %vm1989_vm15 = vmor %vm1987_vm14, %vm1988_vm12  ;;  %v1753_v28 = vadd.f32 %v1752_v27, %v1724_v10 }
 0x27c   : > { %v2119_v4 = vpack.c.bf16 %v1965_v62, %v1950_v43  ;;  %v1984_v37 = vsub.f32 1.0, %v1983_v59  ;;  %v1780_v47 = vadd.f32 %v1779_v1, %v1751_v56  ;;  %3061 = vrcp.f32 %v4016_v14 }
 0x27d   : > { %v2029_v24 = vsub.f32 1.0, %v2028_v35  ;;  %v4050_v31 = vadd.f32 1.0, %v3056_v2  ;;  %v2023_v38 = vand.u32 2147483648, %v4008_v6  ;;  %v1810_v39 = vpop.f32.mrf.mxu1  ;;  %v2021_v44 = vand.u32 2147483647, %v4008_v6 }
 0x27e   : > { %2127 = vst [vmem:[%s3947_s28 + $0x10] sm:$0xff] %v2119_v4  ;;  %v1985_v45 = vmul.f32 %v3052_v23, %v1984_v37  ;;  %v1809_v55 = vadd.f32 %v1808_v63, %v1780_v47  ;;  %v2005_v33 = vsel %vm4060_vm2, %v3961_v61, %v2001_v52  ;;  %vm2017_vm5 = vweird.f32 %v4008_v6 }
 0x27f   : > { %v2030_v50 = vmul.f32 %v4011_v60, %v2029_v24  ;;  %v2009_v57 = vor.u32 1.1754944e-38, %v2008_v17  ;;  %vm2033_vm6 = vweird.f32 %v4011_v60  ;;  %v2024_v61 = vor.u32 1.1754944e-38, %v2023_v38 }
 0x280   : > { %v3058_v16 = vpop.eup %3057  ;;  %v1986_v19 = vadd.f32 %v3052_v23, %v1985_v45  ;;  %v2820_v22 = vmul.f32 -1.442695, %v1809_v55  ;;  %vm2022_vm8 = vcmp.eq.f32.partialorder %v2021_v44, 8.507059e+37  ;;  %vm2032_vm9 = vweird.f32 %v3967_v18 }
 0x281   : > { %v3060_v25 = vpop.eup %3059  ;;  %v4047_v26 = vadd.f32 1.0, %v3058_v16  ;;  %v2010_v59 = vsel %vm4069_vm4, %v2009_v57, %v2005_v33  ;;  %vm4094_vm10 = vmor %vm2032_vm9, %vm2033_vm6  ;;  %v2036_v47 = vand.u32 2147483647, %v3967_v18  ;;  %v2039_v18 = vor.u32 1.1754944e-38, %v2038_v54 }
 0x282   : > { %v1990_v3 = vsel %vm1989_vm15, %v3052_v23, %v1986_v19  ;;  %v2013_v30 = vmul.f32 %v3060_v25, %v4008_v6  ;;  %3063 = vpow2.f32 %v2820_v22  ;;  %v4053_v5 = vpop.eup %3061  ;;  %vm2018_vm3 = vweird.f32 %v3060_v25 }
 0x283   : > { %v1995_v21 = vsel %vm1992_vm0, %v1994_v51, %v1990_v3  ;;  %3065 = vrcp.f32 %v4047_v26  ;;  %v1781_v0 = vpop.f32.mrf.mxu0  ;;  %v2058_v49 = vmul.f32 %v4053_v5, %v4016_v14  ;;  %vm2019_vm7 = vmor %vm2017_vm5, %vm2018_vm3  ;;  %v2031_v6 = vadd.f32 %v4011_v60, %v2030_v50 }
 0x284   : > { %v2120_v32 = vpack.c.bf16 %v1995_v21, %v1980_v9  ;;  %v2014_v34 = vsub.f32 1.0, %v2013_v30  ;;  %v1782_v36 = vadd.f32 %v1781_v0, %v1753_v28  ;;  %3067 = vrcp.f32 %v4050_v31 }
 0x285   : > { %v2059_v62 = vsub.f32 1.0, %v2058_v49  ;;  %v2053_v4 = vand.u32 2147483648, %v4047_v26  ;;  %v2051_v8 = vand.u32 2147483647, %v4047_v26  ;;  %v2035_v10 = vsel %vm4094_vm10, %v4011_v60, %v2031_v6 }
 0x286   : > { %2128 = vst [vmem:[%s3947_s28 + $0x18] sm:$0xff] %v2120_v32  ;;  %v2015_v42 = vmul.f32 %v3060_v25, %v2014_v34  ;;  %v1811_v15 = vadd.f32 %v1810_v39, %v1782_v36  ;;  %vm2047_vm12 = vweird.f32 %v4047_v26  ;;  %vm2037_vm14 = vcmp.eq.f32.partialorder %v2036_v47, 8.507059e+37 }
 0x287   : > { %v2060_v45 = vmul.f32 %v4053_v5, %v2059_v62  ;;  %v2054_v12 = vor.u32 1.1754944e-38, %v2053_v4  ;;  %vm2052_vm15 = vcmp.eq.f32.partialorder %v2051_v8, 8.507059e+37  ;;  %v2040_v9 = vsel %vm2037_vm14, %v2039_v18, %v2035_v10 }
 0x288   : > { %v3064_v48 = vpop.eup %3063  ;;  %v2016_v53 = vadd.f32 %v3060_v25, %v2015_v42  ;;  %v2822_v46 = vmul.f32 -1.442695, %v1811_v15  ;;  %vm2063_vm0 = vweird.f32 %v4053_v5  ;;  %v2068_v51 = vand.u32 2147483648, %v4016_v14 }
 0x289   : > { %v3066_v23 = vpop.eup %3065  ;;  %v4080_v56 = vadd.f32 1.0, %v3064_v48  ;;  %v2061_v19 = vadd.f32 %v4053_v5, %v2060_v45  ;;  %v2066_v28 = vand.u32 2147483647, %v4016_v14  ;;  %vm2064_vm3 = vmor %vm2062_vm1, %vm2063_vm0  ;;  %vm2092_vm9 = vweird.f32 %v4050_v31 }
 0x28a   : > { %v2020_v58 = vsel %vm2019_vm7, %v3060_v25, %v2016_v53  ;;  %v2043_v13 = vmul.f32 %v3066_v23, %v4047_v26  ;;  %3069 = vpow2.f32 %v2822_v46  ;;  %v4087_v20 = vpop.eup %3067  ;;  %vm2048_vm11 = vweird.f32 %v3066_v23 }
 0x28b   : > { %v2025_v43 = vsel %vm2022_vm8, %v2024_v61, %v2020_v58  ;;  %3071 = vrcp.f32 %v4080_v56  ;;  %v2088_v40 = vmul.f32 %v4087_v20, %v4050_v31  ;;  %vm2049_vm13 = vmor %vm2047_vm12, %vm2048_vm11  ;;  %v2083_v26 = vand.u32 2147483648, %v4080_v56 }
 0x28c   : > { %v2121_v63 = vpack.c.bf16 %v2025_v43, %v2010_v59  ;;  %v2044_v1 = vsub.f32 1.0, %v2043_v13  ;;  %v2081_v30 = vand.u32 2147483647, %v4080_v56  ;;  %v2065_v24 = vsel %vm2064_vm3, %v4053_v5, %v2061_v19 }
 0x28d   : > { %v2089_v22 = vsub.f32 1.0, %v2088_v40  ;;  %vm2077_vm4 = vweird.f32 %v4080_v56  ;;  %v2069_v34 = vor.u32 1.1754944e-38, %v2068_v51  ;;  %v2084_v14 = vor.u32 1.1754944e-38, %v2083_v26 }
 0x28e   : > { %2129 = vst [vmem:[%s3947_s28 + $0x20] sm:$0xff] %v2121_v63  ;;  %v2045_v7 = vmul.f32 %v3066_v23, %v2044_v1  ;;  %vm2067_vm6 = vcmp.eq.f32.partialorder %v2066_v28, 8.507059e+37  ;;  %vm2082_vm7 = vcmp.eq.f32.partialorder %v2081_v30, 8.507059e+37  ;;  %vm2093_vm8 = vweird.f32 %v4087_v20 }
 0x28f   : > { %v2090_v21 = vmul.f32 %v4087_v20, %v2089_v22  ;;  %v2070_v38 = vsel %vm2067_vm6, %v2069_v34, %v2065_v24  ;;  %v2098_v44 = vand.u32 2147483648, %v4050_v31  ;;  %v2096_v33 = vand.u32 2147483647, %v4050_v31  ;;  %vm2094_vm11 = vmor %vm2092_vm9, %vm2093_vm8 }
 0x290   : > { %v3070_v11 = vpop.eup %3069  ;;  %v2046_v55 = vadd.f32 %v3066_v23, %v2045_v7 }
 0x291   : > { %v3072_v2 = vpop.eup %3071  ;;  %v1876_v35 = vadd.f32 1.0, %v3070_v11  ;;  %v2091_v41 = vadd.f32 %v4087_v20, %v2090_v21  ;;  %v2099_v53 = vor.u32 1.1754944e-38, %v2098_v44  ;;  %vm2097_vm14 = vcmp.eq.f32.partialorder %v2096_v33, 8.507059e+37 }
 0x292   : > { %v2050_v16 = vsel %vm2049_vm13, %v3066_v23, %v2046_v55  ;;  %v2073_v60 = vmul.f32 %v3072_v2, %v4080_v56  ;;  %vm2078_vm2 = vweird.f32 %v3072_v2 }
 0x293   : > { %v2055_v27 = vsel %vm2052_vm15, %v2054_v12, %v2050_v16  ;;  %3073 = vrcp.f32 %v1876_v35  ;;  %vm2079_vm5 = vmor %vm2077_vm4, %vm2078_vm2  ;;  %v2113_v15 = vand.u32 2147483648, %v1876_v35  ;;  %v2111_v50 = vand.u32 2147483647, %v1876_v35 }
 0x294   : > { %v2122_v25 = vpack.c.bf16 %v2055_v27, %v2040_v9  ;;  %v2074_v52 = vsub.f32 1.0, %v2073_v60  ;;  %v2095_v48 = vsel %vm2094_vm11, %v4087_v20, %v2091_v41  ;;  %vm2107_vm12 = vweird.f32 %v1876_v35 }
 0x295   : > { %v2114_v46 = vor.u32 1.1754944e-38, %v2113_v15  ;;  %vm2112_vm15 = vcmp.eq.f32.partialorder %v2111_v50, 8.507059e+37  ;;  %v2100_v57 = vsel %vm2097_vm14, %v2099_v53, %v2095_v48 }
 0x296   : > { %2130 = vst [vmem:[%s3947_s28 + $0x28] sm:$0xff] %v2122_v25  ;;  %v2075_v3 = vmul.f32 %v3072_v2, %v2074_v52 }
 0x298   : > { %v2076_v0 = vadd.f32 %v3072_v2, %v2075_v3 }
 0x299   : > { %v3074_v32 = vpop.eup %3073 }
 0x29a   : > { %v2080_v36 = vsel %vm2079_vm5, %v3072_v2, %v2076_v0  ;;  %v2103_v17 = vmul.f32 %v3074_v32, %v1876_v35  ;;  %vm2108_vm10 = vweird.f32 %v3074_v32 }
 0x29b   : > { %v2085_v39 = vsel %vm2082_vm7, %v2084_v14, %v2080_v36  ;;  %vm2109_vm13 = vmor %vm2107_vm12, %vm2108_vm10 }
 0x29c   : > { %v2123_v5 = vpack.c.bf16 %v2085_v39, %v2070_v38  ;;  %v2104_v42 = vsub.f32 1.0, %v2103_v17 }
 0x29e   : > { %2131 = vst [vmem:[%s3947_s28 + $0x30] sm:$0xff] %v2123_v5  ;;  %v2105_v29 = vmul.f32 %v3074_v32, %v2104_v42 }
 0x2a0   : > { %v2106_v49 = vadd.f32 %v3074_v32, %v2105_v29 }
 0x2a2   : > { %v2110_v23 = vsel %vm2109_vm13, %v3074_v32, %v2106_v49 }
 0x2a3   : > { %v2115_v61 = vsel %vm2112_vm15, %v2114_v46, %v2110_v23 }
 0x2a4   : > { %v2124_v56 = vpack.c.bf16 %v2115_v61, %v2100_v57 }
 0x2a6   : > { %2132 = vst [vmem:[%s3947_s28 + $0x38] sm:$0xff] %v2124_v56 }
 0x2a7 PF: > { %s18_s24 = sadd.s32 1, %s3115_s24  }
 0x2a8   : > { %p15_p7 = scmp.ge.s32.totalorder %s18_s24, 4  }
 0x2aa   :  { %17 = sbr.rel (!%p15_p7) target bundleno = 1 (0x1), region = 83 }
 0x2af   :  { %2157 = vsyncpa [#allocation3], 1 }
 0x2b0   :  { %2159 = vsyncpa [#allocation3 + $0x1], 1 }

</bundles_post_ra>
